<compile_context>
chip_gen: v7x
topology: tpu7x:2x2x1
jax: 0.10.0
libtpu: 0.0.40
codegen_flags: <defaults>
</compile_context>

<pallas_src>
import functools

import numpy as np
import jax
import jax.numpy as jnp
from jax import lax
from jax.experimental import pallas as pl
from jax.experimental.pallas import tpu as pltpu


# ----------------------------------------------------------------------------
# helpers
# ----------------------------------------------------------------------------
def _round_up(x, m):
    return ((x + m - 1) // m) * m


def _nbytes(a):
    return int(np.prod(a.shape)) * np.dtype(a.dtype).itemsize


def _vmem_budget():
    """Generation-aware VMEM scoped limit and batch-tile cap."""
    cap = 64 * 1024 * 1024
    try:
        cap = int(pltpu.get_tpu_info().vmem_capacity_bytes)
    except Exception:
        pass
    # ~96 MiB on 128-MiB chips (v5e/v6e), ~48 MiB on 64-MiB v7x.
    limit = min(100 * 1024 * 1024, (cap * 3) // 4)
    max_tile = 1024 if cap >= 128 * 1024 * 1024 else 512
    return limit, max_tile


def _pick_batch_tile(batch, max_tile):
    """Largest multiple-of-8 divisor of batch <= max_tile, preferring >= 2 grid
    steps (so v7x's two TensorCores are both used).  Falls back to a single
    full-batch tile (block == full dim keeps (8,128) legality)."""
    if batch % 8 != 0:
        return batch
    cands = [t for t in range(8, min(batch, max_tile) + 1, 8) if batch % t == 0]
    if not cands:
        return batch
    multi = [t for t in cands if batch // t >= 2]
    return max(multi) if multi else max(cands)


def _prep_sparse_inputs(lS_o, lS_i, batch, n_rows_list, min_len=1):
    """torch-style (offsets, indices) -> per-table [batch, L] int32 matrices,
    padded with the out-of-range sentinel n_rows (contributes zero)."""
    idx_mats = []
    for offs, idx, n_rows in zip(lS_o, lS_i, n_rows_list):
        offs = np.asarray(offs, dtype=np.int64)
        idx = np.asarray(idx, dtype=np.int64)
        nnz = int(idx.shape[0])
        ends = np.concatenate([offs[1:], [nnz]])
        lengths = (ends - offs).astype(np.int64)
        L = max(int(lengths.max(initial=0)), min_len)
        mat = np.full((batch, L), n_rows, np.int32)      # sentinel = out of range
        for b in range(batch):
            l = int(lengths[b])
            if l:
                mat[b, :l] = idx[offs[b]:offs[b] + l]
        idx_mats.append(jnp.asarray(mat))
    return idx_mats


# ----------------------------------------------------------------------------
# fused Pallas kernel
# ----------------------------------------------------------------------------
def _dlrm_fused_kernel(*refs, cfg):
    """Fully fused DLRM forward for one batch tile.

    Ref order: dense, (W,b)*n_bot, (idx,table)*num_tables, [pair_seg],
               (W,b)*n_top, out."""
    n_bot = cfg["n_bot"]
    n_top = cfg["n_top"]
    num_tables = cfg["num_tables"]
    bot_acts = cfg["bot_acts"]
    top_acts = cfg["top_acts"]
    pairs = cfg["pairs"]
    interaction_op = cfg["interaction_op"]

    it = iter(refs)
    dense_ref = next(it)
    bot_refs = [(next(it), next(it)) for _ in range(n_bot)]
    emb_refs = [(next(it), next(it)) for _ in range(num_tables)]
    pair_seg_ref = next(it) if (interaction_op == "dot" and pairs) else None
    top_refs = [(next(it), next(it)) for _ in range(n_top)]
    out_ref = next(it)

    tb = dense_ref.shape[0]

    def apply_act(y, act):
        if act == "relu":
            return jnp.maximum(y, 0.0)
        if act == "sigmoid":
            return jax.nn.sigmoid(y)
        return y

    def mxu_dot(a, w):
        # bf16 operands (MXU-native on v5e/v6e/v7x), f32 accumulation.
        return jnp.dot(a.astype(jnp.bfloat16), w.astype(jnp.bfloat16),
                       preferred_element_type=jnp.float32)

    # ---- bottom MLP: all layers fused, intermediates never touch HBM --------
    x = dense_ref[...]
    for (w_ref, b_ref), act in zip(bot_refs, bot_acts):
        x = apply_act(mxu_dot(x, w_ref[...]) + b_ref[...], act)

    # ---- embedding bags (sum mode), tiled with the batch ---------------------
    # counts[b, r] = multiplicity of row r in bag b of this tile (small integers,
    # exact in bf16); sentinel-padded slots never match any row.  bag = counts @ T.
    feats = [x]
    for idx_ref, tbl_ref in emb_refs:
        idx = idx_ref[...]                                    # [tb, L] int32
        L = idx.shape[1]
        n_rows = tbl_ref.shape[0]
        row_iota = lax.broadcasted_iota(jnp.int32, (tb, n_rows), 1)
        counts = jnp.zeros((tb, n_rows), jnp.float32)
        for l in range(L):                                    # L is small & static
            counts = counts + (row_iota == idx[:, l:l + 1]).astype(jnp.float32)
        feats.append(mxu_dot(counts, tbl_ref[...]))           # [tb, m]

    # ---- feature interaction -------------------------------------------------
    if interaction_op == "dot":
        if pairs:
            # all pair products in one lane-dense multiply, segment-reduced on
            # the MXU with a constant 0/1 matrix (no per-pair XLU reduces).
            fi = jnp.concatenate([feats[i] for (i, _) in pairs], axis=1)  # [tb,P*d]
            fj = jnp.concatenate([feats[j] for (_, j) in pairs], axis=1)  # [tb,P*d]
            z = mxu_dot(fi * fj, pair_seg_ref[...])                        # [tb, P]
            r = jnp.concatenate([x, z], axis=1)
        else:
            r = x
    else:  # 'cat'
        r = jnp.concatenate(feats, axis=1)

    # ---- top MLP: last layer zero-padded to a 128-lane-dense output slab -----
    p = r
    for (w_ref, b_ref), act in zip(top_refs, top_acts):
        p = apply_act(mxu_dot(p, w_ref[...]) + b_ref[...], act)

    out_ref[...] = p.astype(out_ref.dtype)


# ----------------------------------------------------------------------------
# wrapper: parameter prep + pallas_call
# ----------------------------------------------------------------------------
def dlrm_forward(dense_x, lS_o, lS_i, bot_params, top_params, emb_tables,
                 sigmoid_bot=-1, sigmoid_top=-1, arch_interaction_op="dot",
                 arch_interaction_itself=False, loss_threshold=0.0,
                 max_batch_tile=None):
    if arch_interaction_op not in ("dot", "cat"):
        raise ValueError(f"unsupported interaction op: {arch_interaction_op}")

    dense_x = jnp.asarray(dense_x, jnp.float32)
    batch, d0 = dense_x.shape
    emb_tables = [jnp.asarray(t, jnp.float32) for t in emb_tables]
    num_tables = len(emb_tables)
    n_bot, n_top = len(bot_params), len(top_params)

    bot_acts = tuple("sigmoid" if i == sigmoid_bot else "relu" for i in range(n_bot))
    top_acts = tuple("sigmoid" if i == sigmoid_top else "relu" for i in range(n_top))

    # zero-pad the final layer so the kernel writes a lane-dense [tb, 128k] slab
    w_last, b_last = top_params[-1]
    w_last = jnp.asarray(w_last, jnp.float32)
    b_last = jnp.asarray(b_last, jnp.float32)
    out_true = int(w_last.shape[1])
    out_pad = _round_up(out_true, 128)
    if out_pad != out_true:
        w_last = jnp.pad(w_last, ((0, 0), (0, out_pad - out_true)))
        b_last = jnp.pad(b_last, ((0, 0), (0, out_pad - out_true)))
    top_params = list(top_params[:-1]) + [(w_last, b_last)]

    # sparse inputs -> [batch, L] sentinel-padded index matrices (batch-tiled)
    n_rows_list = [int(t.shape[0]) for t in emb_tables]
    idx_mats = _prep_sparse_inputs(lS_o, lS_i, batch, n_rows_list)

    # interaction pair list (lower triangle, optional diagonal), torch order
    num_feat = 1 + num_tables
    offset = 1 if arch_interaction_itself else 0
    pairs = tuple((i, j) for i in range(num_feat) for j in range(i + offset))
    d_feat = int(jnp.asarray(bot_params[-1][0]).shape[1]) if n_bot else int(d0)

    # host-built [P*d, P] 0/1 segment-reduce matrix for the interaction
    pair_seg = None
    if arch_interaction_op == "dot" and pairs:
        P = len(pairs)
        seg_np = np.zeros((P * d_feat, P), np.float32)
        for p_i in range(P):
            seg_np[p_i * d_feat:(p_i + 1) * d_feat, p_i] = 1.0
        pair_seg = jnp.asarray(seg_np)

    vmem_limit, tile_cap = _vmem_budget()
    if max_batch_tile is None:
        max_batch_tile = tile_cap
    tb = _pick_batch_tile(batch, max_batch_tile)
    grid = (batch // tb,)

    cfg = dict(n_bot=n_bot, n_top=n_top, num_tables=num_tables,
               bot_acts=bot_acts, top_acts=top_acts, pairs=pairs,
               interaction_op=arch_interaction_op)
    kernel = functools.partial(_dlrm_fused_kernel, cfg=cfg)

    # inputs (order must match the kernel's ref parsing)
    inputs = [dense_x]
    for w, b in bot_params:
        inputs += [jnp.asarray(w, jnp.float32), jnp.asarray(b, jnp.float32)]
    for k in range(num_tables):
        inputs += [idx_mats[k], emb_tables[k]]
    if pair_seg is not None:
        inputs += [pair_seg]
    for w, b in top_params:
        inputs += [jnp.asarray(w, jnp.float32), jnp.asarray(b, jnp.float32)]

    # advisory cost estimate for the XLA scheduler
    flops = 2 * batch * len(pairs) * d_feat
    for w, _ in list(bot_params) + list(top_params):
        flops += 2 * batch * int(w.shape[0]) * int(w.shape[1])
    for t in emb_tables:
        flops += 2 * batch * int(t.shape[0]) * int(t.shape[1])
    transcendentals = 0
    if 0 <= sigmoid_bot < n_bot:
        transcendentals += batch * int(jnp.asarray(bot_params[sigmoid_bot][0]).shape[1])
    if 0 <= sigmoid_top < n_top:
        transcendentals += batch * int(top_params[sigmoid_top][0].shape[1])
    bytes_accessed = batch * out_pad * 4 + sum(_nbytes(a) for a in inputs)
    cost = pl.CostEstimate(flops=int(flops), transcendentals=int(transcendentals),
                           bytes_accessed=int(bytes_accessed))

    def build(single_buffer):
        def const_spec(arr):
            zeros = (0,) * arr.ndim
            if single_buffer:
                # grid-invariant operand: no double-buffering in VMEM
                return pl.BlockSpec(tuple(arr.shape), lambda i, _z=zeros: _z,
                                    pipeline_mode=pl.Buffered(1))
            return pl.BlockSpec(tuple(arr.shape), lambda i, _z=zeros: _z)

        in_specs = [pl.BlockSpec((tb, int(d0)), lambda i: (i, 0))]
        for w, b in bot_params:
            in_specs += [const_spec(w), const_spec(b)]
        for k in range(num_tables):
            L = int(idx_mats[k].shape[1])
            in_specs += [pl.BlockSpec((tb, L), lambda i: (i, 0)),
                         const_spec(emb_tables[k])]
        if pair_seg is not None:
            in_specs += [const_spec(pair_seg)]
        for w, b in top_params:
            in_specs += [const_spec(w), const_spec(b)]
        out_spec = pl.BlockSpec((tb, out_pad), lambda i: (i, 0))

        return pl.pallas_call(
            kernel,
            out_shape=jax.ShapeDtypeStruct((batch, out_pad), jnp.float32),
            grid=grid,
            in_specs=in_specs,
            out_specs=out_spec,
            compiler_params=pltpu.CompilerParams(
                dimension_semantics=("parallel",),       # batch tiles independent
                vmem_limit_bytes=int(vmem_limit)),
            cost_estimate=cost,
        )

    try:
        out_padded = build(single_buffer=True)(*inputs)
    except Exception:
        # pl.Buffered(1) single-buffering may be unsupported on some jax/Mosaic
        # versions; fall back to default pipelining (correctness unaffected).
        out_padded = build(single_buffer=False)(*inputs)

    p = out_padded[:, :out_true]
    if 0.0 < loss_threshold < 1.0:
        p = jnp.clip(p, loss_threshold, 1.0 - loss_threshold)
    return p


# ----------------------------------------------------------------------------
# parameter construction matching DLRM_Net init
# ----------------------------------------------------------------------------
def make_mlp_params(ln, rng):
    """W ~ N(0, sqrt(2/(m+n))), b ~ N(0, sqrt(1/m)); stored transposed [in, out]."""
    params = []
    for i in range(len(ln) - 1):
        n, m = int(ln[i]), int(ln[i + 1])
        W = rng.normal(0.0, np.sqrt(2.0 / (m + n)), size=(m, n)).astype(np.float32)
        bt = rng.normal(0.0, np.sqrt(1.0 / m), size=(m,)).astype(np.float32)
        params.append((jnp.asarray(W.T), jnp.asarray(bt.reshape(1, m))))
    return params


def make_emb_tables(m_spa, ln_emb, rng):
    """EmbeddingBag weights ~ U(-sqrt(1/n), sqrt(1/n))."""
    tables = []
    for n in ln_emb:
        n = int(n)
        W = rng.uniform(-np.sqrt(1.0 / n), np.sqrt(1.0 / n),
                        size=(n, m_spa)).astype(np.float32)
        tables.append(jnp.asarray(W))
    return tables


# ----------------------------------------------------------------------------
# pure-JAX reference for correctness check
# ----------------------------------------------------------------------------
def ref_forward(dense_x, lS_o, lS_i, bot_params, top_params, emb_tables,
                sigmoid_bot, sigmoid_top, arch_interaction_itself=False):
    x = jnp.asarray(dense_x)
    for i, (w, b) in enumerate(bot_params):
        x = x @ w + b
        x = jax.nn.sigmoid(x) if i == sigmoid_bot else jnp.maximum(x, 0.0)
    batch = x.shape[0]
    ly = []
    for k, tbl in enumerate(emb_tables):
        offs = np.asarray(lS_o[k])
        idx = np.asarray(lS_i[k])
        offs_ext = np.concatenate([offs, [idx.shape[0]]]).astype(np.int64)
        V = jnp.stack([jnp.sum(tbl[idx[offs_ext[b]:offs_ext[b + 1]]], axis=0)
                       for b in range(batch)])
        ly.append(V)
    d = x.shape[1]
    T = jnp.concatenate([x] + ly, axis=1).reshape(batch, -1, d)
    Z = jnp.einsum("bfd,bgd->bfg", T, T)
    F = T.shape[1]
    offset = 1 if arch_interaction_itself else 0
    li = np.array([i for i in range(F) for j in range(i + offset)], dtype=np.int32)
    lj = np.array([j for i in range(F) for j in range(i + offset)], dtype=np.int32)
    R = jnp.concatenate([x, Z[:, li, lj]], axis=1)
    p = R
    for i, (w, b) in enumerate(top_params):
        p = p @ w + b
        p = jax.nn.sigmoid(p) if i == sigmoid_top else jnp.maximum(p, 0.0)
    return p


# ----------------------------------------------------------------------------
if __name__ == "__main__":
    # small DLRM configuration (batch 16 -> 2 parallel batch tiles of 8)
    B = 16
    m_spa = 16
    ln_emb = np.array([50, 60, 70])
    ln_bot = np.array([13, 32, 16])                     # bottom MLP: 13 -> 32 -> 16
    num_feat = 1 + ln_emb.size                          # dense + 3 sparse = 4
    num_int = m_spa + num_feat * (num_feat - 1) // 2    # 16 + 6 = 22
    ln_top = np.array([num_int, 32, 1])                 # top MLP: 22 -> 32 -> 1
    sigmoid_bot = -1
    sigmoid_top = ln_top.size - 2                       # sigmoid on last top layer

    # deterministic parameters
    prng = np.random.default_rng(0)
    bot_params = make_mlp_params(ln_bot, prng)
    top_params = make_mlp_params(ln_top, prng)
    emb_tables = make_emb_tables(m_spa, ln_emb, prng)

    # deterministic inputs
    key = jax.random.PRNGKey(0)
    keys = jax.random.split(key, 1 + 2 * ln_emb.size)
    dense_x = jax.random.normal(keys[0], (B, int(ln_bot[0])), dtype=jnp.float32)

    lS_i, lS_o = [], []
    for k in range(ln_emb.size):
        lengths = np.array(
            jax.random.randint(keys[1 + 2 * k], (B,), 1, 5, dtype=jnp.int32))
        if k == 0:
            lengths[0] = 0        # exercise the empty-bag case (sum -> zeros)
        offsets = np.concatenate([[0], np.cumsum(lengths)[:-1]]).astype(np.int32)
        nnz = int(lengths.sum())
        idx = np.array(
            jax.random.randint(keys[2 + 2 * k], (nnz,), 0, int(ln_emb[k]),
                               dtype=jnp.int32))
        lS_i.append(idx)
        lS_o.append(offsets)

    out = dlrm_forward(
        dense_x, lS_o, lS_i, bot_params, top_params, emb_tables,
        sigmoid_bot=sigmoid_bot, sigmoid_top=sigmoid_top,
        arch_interaction_op="dot", arch_interaction_itself=False,
        loss_threshold=0.0,
    )
    out = jax.block_until_ready(out)

    ref = ref_forward(
        dense_x, lS_o, lS_i, bot_params, top_params, emb_tables,
        sigmoid_bot, sigmoid_top, arch_interaction_itself=False,
    )
    # bf16 MXU operands -> loosened tolerance (f32 accumulation keeps it tight)
    np.testing.assert_allclose(np.asarray(out), np.asarray(ref),
                               rtol=2e-2, atol=2e-2)
    assert out.shape == (B, 1)

    print("KERNEL_OK")
</pallas_src>

<mosaic_0001>
module attributes {stable_mosaic.version = 11 : i64} {
  func.func @_dlrm_fused_kernel(%arg0: i32, %arg1: memref<8x13xf32, #tpu.memory_space<vmem>>, %arg2: memref<13x32xf32, #tpu.memory_space<vmem>>, %arg3: memref<1x32xf32, #tpu.memory_space<vmem>>, %arg4: memref<32x16xf32, #tpu.memory_space<vmem>>, %arg5: memref<1x16xf32, #tpu.memory_space<vmem>>, %arg6: memref<8x4xi32, #tpu.memory_space<vmem>>, %arg7: memref<50x16xf32, #tpu.memory_space<vmem>>, %arg8: memref<8x4xi32, #tpu.memory_space<vmem>>, %arg9: memref<60x16xf32, #tpu.memory_space<vmem>>, %arg10: memref<8x4xi32, #tpu.memory_space<vmem>>, %arg11: memref<70x16xf32, #tpu.memory_space<vmem>>, %arg12: memref<96x6xf32, #tpu.memory_space<vmem>>, %arg13: memref<22x32xf32, #tpu.memory_space<vmem>>, %arg14: memref<1x32xf32, #tpu.memory_space<vmem>>, %arg15: memref<32x128xf32, #tpu.memory_space<vmem>>, %arg16: memref<1x128xf32, #tpu.memory_space<vmem>>, %arg17: memref<8x128xf32, #tpu.memory_space<vmem>>) attributes {dimension_semantics = [#tpu.dimension_semantics<parallel>], iteration_bounds = array<i64: 2>, scalar_prefetch = 0 : i64, scratch_operands = 0 : i64, tpu.core_type = #tpu.core_type<tc>, window_params = [{transform_indices = @transform_0, window_bounds = array<i64: 8, 13>}, {pipeline_mode = #tpu.pipeline_mode<synchronous>, transform_indices = @transform_1, window_bounds = array<i64: 13, 32>}, {pipeline_mode = #tpu.pipeline_mode<synchronous>, transform_indices = @transform_2, window_bounds = array<i64: 1, 32>}, {pipeline_mode = #tpu.pipeline_mode<synchronous>, transform_indices = @transform_3, window_bounds = array<i64: 32, 16>}, {pipeline_mode = #tpu.pipeline_mode<synchronous>, transform_indices = @transform_4, window_bounds = array<i64: 1, 16>}, {transform_indices = @transform_5, window_bounds = array<i64: 8, 4>}, {pipeline_mode = #tpu.pipeline_mode<synchronous>, transform_indices = @transform_6, window_bounds = array<i64: 50, 16>}, {transform_indices = @transform_7, window_bounds = array<i64: 8, 4>}, {pipeline_mode = #tpu.pipeline_mode<synchronous>, transform_indices = @transform_8, window_bounds = array<i64: 60, 16>}, {transform_indices = @transform_9, window_bounds = array<i64: 8, 4>}, {pipeline_mode = #tpu.pipeline_mode<synchronous>, transform_indices = @transform_10, window_bounds = array<i64: 70, 16>}, {pipeline_mode = #tpu.pipeline_mode<synchronous>, transform_indices = @transform_11, window_bounds = array<i64: 96, 6>}, {pipeline_mode = #tpu.pipeline_mode<synchronous>, transform_indices = @transform_12, window_bounds = array<i64: 22, 32>}, {pipeline_mode = #tpu.pipeline_mode<synchronous>, transform_indices = @transform_13, window_bounds = array<i64: 1, 32>}, {pipeline_mode = #tpu.pipeline_mode<synchronous>, transform_indices = @transform_14, window_bounds = array<i64: 32, 128>}, {pipeline_mode = #tpu.pipeline_mode<synchronous>, transform_indices = @transform_15, window_bounds = array<i64: 1, 128>}, {transform_indices = @transform_16, window_bounds = array<i64: 8, 128>}]} {
    %c0 = arith.constant 0 : index
    %c0_0 = arith.constant 0 : index
    %0 = vector.load %arg1[%c0, %c0_0] : memref<8x13xf32, #tpu.memory_space<vmem>>, vector<8x13xf32>
    %c0_1 = arith.constant 0 : index
    %c0_2 = arith.constant 0 : index
    %1 = vector.load %arg2[%c0_1, %c0_2] : memref<13x32xf32, #tpu.memory_space<vmem>>, vector<13x32xf32>
    %2 = arith.truncf %0 : vector<8x13xf32> to vector<8x13xbf16>
    %3 = arith.truncf %1 : vector<13x32xf32> to vector<13x32xbf16>
    %cst = arith.constant dense<0.000000e+00> : vector<8x32xf32>
    %4 = tpu.matmul %2, %3, %cst {dimension_numbers = #tpu.dot_dimension_numbers<[1], [0], [0], [1], [0, 0, 1, 1], [], []>} : vector<8x13xbf16>, vector<13x32xbf16>, vector<8x32xf32> -> vector<8x32xf32>
    %c0_3 = arith.constant 0 : index
    %c0_4 = arith.constant 0 : index
    %5 = vector.load %arg3[%c0_3, %c0_4] : memref<1x32xf32, #tpu.memory_space<vmem>>, vector<1x32xf32>
    %6 = vector.broadcast %5 : vector<1x32xf32> to vector<8x32xf32>
    %7 = arith.addf %4, %6 : vector<8x32xf32>
    %cst_5 = arith.constant 0.000000e+00 : f32
    %8 = vector.broadcast %cst_5 : f32 to vector<8x32xf32>
    %9 = arith.maximumf %7, %8 : vector<8x32xf32>
    %c0_6 = arith.constant 0 : index
    %c0_7 = arith.constant 0 : index
    %10 = vector.load %arg4[%c0_6, %c0_7] : memref<32x16xf32, #tpu.memory_space<vmem>>, vector<32x16xf32>
    %11 = arith.truncf %9 : vector<8x32xf32> to vector<8x32xbf16>
    %12 = arith.truncf %10 : vector<32x16xf32> to vector<32x16xbf16>
    %cst_8 = arith.constant dense<0.000000e+00> : vector<8x16xf32>
    %13 = tpu.matmul %11, %12, %cst_8 {dimension_numbers = #tpu.dot_dimension_numbers<[1], [0], [0], [1], [0, 0, 1, 1], [], []>} : vector<8x32xbf16>, vector<32x16xbf16>, vector<8x16xf32> -> vector<8x16xf32>
    %c0_9 = arith.constant 0 : index
    %c0_10 = arith.constant 0 : index
    %14 = vector.load %arg5[%c0_9, %c0_10] : memref<1x16xf32, #tpu.memory_space<vmem>>, vector<1x16xf32>
    %15 = vector.broadcast %14 : vector<1x16xf32> to vector<8x16xf32>
    %16 = arith.addf %13, %15 : vector<8x16xf32>
    %cst_11 = arith.constant 0.000000e+00 : f32
    %17 = vector.broadcast %cst_11 : f32 to vector<8x16xf32>
    %18 = arith.maximumf %16, %17 : vector<8x16xf32>
    %c0_12 = arith.constant 0 : index
    %c0_13 = arith.constant 0 : index
    %19 = vector.load %arg6[%c0_12, %c0_13] : memref<8x4xi32, #tpu.memory_space<vmem>>, vector<8x4xi32>
    %20 = tpu.iota {dimensions = array<i32: 1>} : vector<8x50xi32>
    %cst_14 = arith.constant 0.000000e+00 : f32
    %21 = vector.broadcast %cst_14 : f32 to vector<8x50xf32>
    %22 = vector.extract_strided_slice %19 {offsets = [0, 0], sizes = [8, 1], strides = [1, 1]} : vector<8x4xi32> to vector<8x1xi32>
    %23 = vector.broadcast %22 : vector<8x1xi32> to vector<8x50xi32>
    %24 = arith.cmpi eq, %20, %23 : vector<8x50xi32>
    %25 = arith.extui %24 : vector<8x50xi1> to vector<8x50xi32>
    %26 = arith.sitofp %25 : vector<8x50xi32> to vector<8x50xf32>
    %27 = arith.addf %21, %26 : vector<8x50xf32>
    %28 = vector.extract_strided_slice %19 {offsets = [0, 1], sizes = [8, 1], strides = [1, 1]} : vector<8x4xi32> to vector<8x1xi32>
    %29 = vector.broadcast %28 : vector<8x1xi32> to vector<8x50xi32>
    %30 = arith.cmpi eq, %20, %29 : vector<8x50xi32>
    %31 = arith.extui %30 : vector<8x50xi1> to vector<8x50xi32>
    %32 = arith.sitofp %31 : vector<8x50xi32> to vector<8x50xf32>
    %33 = arith.addf %27, %32 : vector<8x50xf32>
    %34 = vector.extract_strided_slice %19 {offsets = [0, 2], sizes = [8, 1], strides = [1, 1]} : vector<8x4xi32> to vector<8x1xi32>
    %35 = vector.broadcast %34 : vector<8x1xi32> to vector<8x50xi32>
    %36 = arith.cmpi eq, %20, %35 : vector<8x50xi32>
    %37 = arith.extui %36 : vector<8x50xi1> to vector<8x50xi32>
    %38 = arith.sitofp %37 : vector<8x50xi32> to vector<8x50xf32>
    %39 = arith.addf %33, %38 : vector<8x50xf32>
    %40 = vector.extract_strided_slice %19 {offsets = [0, 3], sizes = [8, 1], strides = [1, 1]} : vector<8x4xi32> to vector<8x1xi32>
    %41 = vector.broadcast %40 : vector<8x1xi32> to vector<8x50xi32>
    %42 = arith.cmpi eq, %20, %41 : vector<8x50xi32>
    %43 = arith.extui %42 : vector<8x50xi1> to vector<8x50xi32>
    %44 = arith.sitofp %43 : vector<8x50xi32> to vector<8x50xf32>
    %45 = arith.addf %39, %44 : vector<8x50xf32>
    %c0_15 = arith.constant 0 : index
    %c0_16 = arith.constant 0 : index
    %46 = vector.load %arg7[%c0_15, %c0_16] : memref<50x16xf32, #tpu.memory_space<vmem>>, vector<50x16xf32>
    %47 = arith.truncf %45 : vector<8x50xf32> to vector<8x50xbf16>
    %48 = arith.truncf %46 : vector<50x16xf32> to vector<50x16xbf16>
    %cst_17 = arith.constant dense<0.000000e+00> : vector<8x16xf32>
    %49 = tpu.matmul %47, %48, %cst_17 {dimension_numbers = #tpu.dot_dimension_numbers<[1], [0], [0], [1], [0, 0, 1, 1], [], []>} : vector<8x50xbf16>, vector<50x16xbf16>, vector<8x16xf32> -> vector<8x16xf32>
    %c0_18 = arith.constant 0 : index
    %c0_19 = arith.constant 0 : index
    %50 = vector.load %arg8[%c0_18, %c0_19] : memref<8x4xi32, #tpu.memory_space<vmem>>, vector<8x4xi32>
    %51 = tpu.iota {dimensions = array<i32: 1>} : vector<8x60xi32>
    %cst_20 = arith.constant 0.000000e+00 : f32
    %52 = vector.broadcast %cst_20 : f32 to vector<8x60xf32>
    %53 = vector.extract_strided_slice %50 {offsets = [0, 0], sizes = [8, 1], strides = [1, 1]} : vector<8x4xi32> to vector<8x1xi32>
    %54 = vector.broadcast %53 : vector<8x1xi32> to vector<8x60xi32>
    %55 = arith.cmpi eq, %51, %54 : vector<8x60xi32>
    %56 = arith.extui %55 : vector<8x60xi1> to vector<8x60xi32>
    %57 = arith.sitofp %56 : vector<8x60xi32> to vector<8x60xf32>
    %58 = arith.addf %52, %57 : vector<8x60xf32>
    %59 = vector.extract_strided_slice %50 {offsets = [0, 1], sizes = [8, 1], strides = [1, 1]} : vector<8x4xi32> to vector<8x1xi32>
    %60 = vector.broadcast %59 : vector<8x1xi32> to vector<8x60xi32>
    %61 = arith.cmpi eq, %51, %60 : vector<8x60xi32>
    %62 = arith.extui %61 : vector<8x60xi1> to vector<8x60xi32>
    %63 = arith.sitofp %62 : vector<8x60xi32> to vector<8x60xf32>
    %64 = arith.addf %58, %63 : vector<8x60xf32>
    %65 = vector.extract_strided_slice %50 {offsets = [0, 2], sizes = [8, 1], strides = [1, 1]} : vector<8x4xi32> to vector<8x1xi32>
    %66 = vector.broadcast %65 : vector<8x1xi32> to vector<8x60xi32>
    %67 = arith.cmpi eq, %51, %66 : vector<8x60xi32>
    %68 = arith.extui %67 : vector<8x60xi1> to vector<8x60xi32>
    %69 = arith.sitofp %68 : vector<8x60xi32> to vector<8x60xf32>
    %70 = arith.addf %64, %69 : vector<8x60xf32>
    %71 = vector.extract_strided_slice %50 {offsets = [0, 3], sizes = [8, 1], strides = [1, 1]} : vector<8x4xi32> to vector<8x1xi32>
    %72 = vector.broadcast %71 : vector<8x1xi32> to vector<8x60xi32>
    %73 = arith.cmpi eq, %51, %72 : vector<8x60xi32>
    %74 = arith.extui %73 : vector<8x60xi1> to vector<8x60xi32>
    %75 = arith.sitofp %74 : vector<8x60xi32> to vector<8x60xf32>
    %76 = arith.addf %70, %75 : vector<8x60xf32>
    %c0_21 = arith.constant 0 : index
    %c0_22 = arith.constant 0 : index
    %77 = vector.load %arg9[%c0_21, %c0_22] : memref<60x16xf32, #tpu.memory_space<vmem>>, vector<60x16xf32>
    %78 = arith.truncf %76 : vector<8x60xf32> to vector<8x60xbf16>
    %79 = arith.truncf %77 : vector<60x16xf32> to vector<60x16xbf16>
    %cst_23 = arith.constant dense<0.000000e+00> : vector<8x16xf32>
    %80 = tpu.matmul %78, %79, %cst_23 {dimension_numbers = #tpu.dot_dimension_numbers<[1], [0], [0], [1], [0, 0, 1, 1], [], []>} : vector<8x60xbf16>, vector<60x16xbf16>, vector<8x16xf32> -> vector<8x16xf32>
    %c0_24 = arith.constant 0 : index
    %c0_25 = arith.constant 0 : index
    %81 = vector.load %arg10[%c0_24, %c0_25] : memref<8x4xi32, #tpu.memory_space<vmem>>, vector<8x4xi32>
    %82 = tpu.iota {dimensions = array<i32: 1>} : vector<8x70xi32>
    %cst_26 = arith.constant 0.000000e+00 : f32
    %83 = vector.broadcast %cst_26 : f32 to vector<8x70xf32>
    %84 = vector.extract_strided_slice %81 {offsets = [0, 0], sizes = [8, 1], strides = [1, 1]} : vector<8x4xi32> to vector<8x1xi32>
    %85 = vector.broadcast %84 : vector<8x1xi32> to vector<8x70xi32>
    %86 = arith.cmpi eq, %82, %85 : vector<8x70xi32>
    %87 = arith.extui %86 : vector<8x70xi1> to vector<8x70xi32>
    %88 = arith.sitofp %87 : vector<8x70xi32> to vector<8x70xf32>
    %89 = arith.addf %83, %88 : vector<8x70xf32>
    %90 = vector.extract_strided_slice %81 {offsets = [0, 1], sizes = [8, 1], strides = [1, 1]} : vector<8x4xi32> to vector<8x1xi32>
    %91 = vector.broadcast %90 : vector<8x1xi32> to vector<8x70xi32>
    %92 = arith.cmpi eq, %82, %91 : vector<8x70xi32>
    %93 = arith.extui %92 : vector<8x70xi1> to vector<8x70xi32>
    %94 = arith.sitofp %93 : vector<8x70xi32> to vector<8x70xf32>
    %95 = arith.addf %89, %94 : vector<8x70xf32>
    %96 = vector.extract_strided_slice %81 {offsets = [0, 2], sizes = [8, 1], strides = [1, 1]} : vector<8x4xi32> to vector<8x1xi32>
    %97 = vector.broadcast %96 : vector<8x1xi32> to vector<8x70xi32>
    %98 = arith.cmpi eq, %82, %97 : vector<8x70xi32>
    %99 = arith.extui %98 : vector<8x70xi1> to vector<8x70xi32>
    %100 = arith.sitofp %99 : vector<8x70xi32> to vector<8x70xf32>
    %101 = arith.addf %95, %100 : vector<8x70xf32>
    %102 = vector.extract_strided_slice %81 {offsets = [0, 3], sizes = [8, 1], strides = [1, 1]} : vector<8x4xi32> to vector<8x1xi32>
    %103 = vector.broadcast %102 : vector<8x1xi32> to vector<8x70xi32>
    %104 = arith.cmpi eq, %82, %103 : vector<8x70xi32>
    %105 = arith.extui %104 : vector<8x70xi1> to vector<8x70xi32>
    %106 = arith.sitofp %105 : vector<8x70xi32> to vector<8x70xf32>
    %107 = arith.addf %101, %106 : vector<8x70xf32>
    %c0_27 = arith.constant 0 : index
    %c0_28 = arith.constant 0 : index
    %108 = vector.load %arg11[%c0_27, %c0_28] : memref<70x16xf32, #tpu.memory_space<vmem>>, vector<70x16xf32>
    %109 = arith.truncf %107 : vector<8x70xf32> to vector<8x70xbf16>
    %110 = arith.truncf %108 : vector<70x16xf32> to vector<70x16xbf16>
    %cst_29 = arith.constant dense<0.000000e+00> : vector<8x16xf32>
    %111 = tpu.matmul %109, %110, %cst_29 {dimension_numbers = #tpu.dot_dimension_numbers<[1], [0], [0], [1], [0, 0, 1, 1], [], []>} : vector<8x70xbf16>, vector<70x16xbf16>, vector<8x16xf32> -> vector<8x16xf32>
    %112 = tpu.concatenate %49, %80, %80, %111, %111, %111 in 1 : vector<8x16xf32>, vector<8x16xf32>, vector<8x16xf32>, vector<8x16xf32>, vector<8x16xf32>, vector<8x16xf32> -> vector<8x96xf32>
    %113 = tpu.concatenate %18, %18, %49, %18, %49, %80 in 1 : vector<8x16xf32>, vector<8x16xf32>, vector<8x16xf32>, vector<8x16xf32>, vector<8x16xf32>, vector<8x16xf32> -> vector<8x96xf32>
    %114 = arith.mulf %112, %113 : vector<8x96xf32>
    %c0_30 = arith.constant 0 : index
    %c0_31 = arith.constant 0 : index
    %115 = vector.load %arg12[%c0_30, %c0_31] : memref<96x6xf32, #tpu.memory_space<vmem>>, vector<96x6xf32>
    %116 = arith.truncf %114 : vector<8x96xf32> to vector<8x96xbf16>
    %117 = arith.truncf %115 : vector<96x6xf32> to vector<96x6xbf16>
    %cst_32 = arith.constant dense<0.000000e+00> : vector<8x6xf32>
    %118 = tpu.matmul %116, %117, %cst_32 {dimension_numbers = #tpu.dot_dimension_numbers<[1], [0], [0], [1], [0, 0, 1, 1], [], []>} : vector<8x96xbf16>, vector<96x6xbf16>, vector<8x6xf32> -> vector<8x6xf32>
    %119 = tpu.concatenate %18, %118 in 1 : vector<8x16xf32>, vector<8x6xf32> -> vector<8x22xf32>
    %c0_33 = arith.constant 0 : index
    %c0_34 = arith.constant 0 : index
    %120 = vector.load %arg13[%c0_33, %c0_34] : memref<22x32xf32, #tpu.memory_space<vmem>>, vector<22x32xf32>
    %121 = arith.truncf %119 : vector<8x22xf32> to vector<8x22xbf16>
    %122 = arith.truncf %120 : vector<22x32xf32> to vector<22x32xbf16>
    %cst_35 = arith.constant dense<0.000000e+00> : vector<8x32xf32>
    %123 = tpu.matmul %121, %122, %cst_35 {dimension_numbers = #tpu.dot_dimension_numbers<[1], [0], [0], [1], [0, 0, 1, 1], [], []>} : vector<8x22xbf16>, vector<22x32xbf16>, vector<8x32xf32> -> vector<8x32xf32>
    %c0_36 = arith.constant 0 : index
    %c0_37 = arith.constant 0 : index
    %124 = vector.load %arg14[%c0_36, %c0_37] : memref<1x32xf32, #tpu.memory_space<vmem>>, vector<1x32xf32>
    %125 = vector.broadcast %124 : vector<1x32xf32> to vector<8x32xf32>
    %126 = arith.addf %123, %125 : vector<8x32xf32>
    %cst_38 = arith.constant 0.000000e+00 : f32
    %127 = vector.broadcast %cst_38 : f32 to vector<8x32xf32>
    %128 = arith.maximumf %126, %127 : vector<8x32xf32>
    %c0_39 = arith.constant 0 : index
    %c0_40 = arith.constant 0 : index
    %129 = vector.load %arg15[%c0_39, %c0_40] : memref<32x128xf32, #tpu.memory_space<vmem>>, vector<32x128xf32>
    %130 = arith.truncf %128 : vector<8x32xf32> to vector<8x32xbf16>
    %131 = arith.truncf %129 : vector<32x128xf32> to vector<32x128xbf16>
    %cst_41 = arith.constant dense<0.000000e+00> : vector<8x128xf32>
    %132 = tpu.matmul %130, %131, %cst_41 {dimension_numbers = #tpu.dot_dimension_numbers<[1], [0], [0], [1], [0, 0, 1, 1], [], []>} : vector<8x32xbf16>, vector<32x128xbf16>, vector<8x128xf32> -> vector<8x128xf32>
    %c0_42 = arith.constant 0 : index
    %c0_43 = arith.constant 0 : index
    %133 = vector.load %arg16[%c0_42, %c0_43] : memref<1x128xf32, #tpu.memory_space<vmem>>, vector<1x128xf32>
    %134 = vector.broadcast %133 : vector<1x128xf32> to vector<8x128xf32>
    %135 = arith.addf %132, %134 : vector<8x128xf32>
    %136 = arith.negf %135 : vector<8x128xf32>
    %137 = math.exp %136 : vector<8x128xf32>
    %cst_44 = arith.constant 1.000000e+00 : f32
    %138 = vector.broadcast %cst_44 : f32 to vector<8x128xf32>
    %139 = arith.addf %138, %137 : vector<8x128xf32>
    %140 = arith.divf %138, %139 : vector<8x128xf32>
    %c0_45 = arith.constant 0 : index
    %c0_46 = arith.constant 0 : index
    %141 = vector.load %arg17[%c0_45, %c0_46] : memref<8x128xf32, #tpu.memory_space<vmem>>, vector<8x128xf32>
    tpu.vector_store %arg17[%c0_45, %c0_46], %140 {strides = array<i32>} : memref<8x128xf32, #tpu.memory_space<vmem>>, vector<8x128xf32>,
    return
  }
  func.func @transform_0(%arg0: i32) -> (i32, i32) {
    %c0_i32 = arith.constant 0 : i32
    %c0_i32_0 = arith.constant 0 : i32
    return %arg0, %c0_i32 : i32, i32
  }
  func.func @transform_1(%arg0: i32) -> (i32, i32) {
    %c0_i32 = arith.constant 0 : i32
    %c0_i32_0 = arith.constant 0 : i32
    %c0_i32_1 = arith.constant 0 : i32
    return %c0_i32, %c0_i32_0 : i32, i32
  }
  func.func @transform_2(%arg0: i32) -> (i32, i32) {
    %c0_i32 = arith.constant 0 : i32
    %c0_i32_0 = arith.constant 0 : i32
    %c0_i32_1 = arith.constant 0 : i32
    return %c0_i32, %c0_i32_0 : i32, i32
  }
  func.func @transform_3(%arg0: i32) -> (i32, i32) {
    %c0_i32 = arith.constant 0 : i32
    %c0_i32_0 = arith.constant 0 : i32
    %c0_i32_1 = arith.constant 0 : i32
    return %c0_i32, %c0_i32_0 : i32, i32
  }
  func.func @transform_4(%arg0: i32) -> (i32, i32) {
    %c0_i32 = arith.constant 0 : i32
    %c0_i32_0 = arith.constant 0 : i32
    %c0_i32_1 = arith.constant 0 : i32
    return %c0_i32, %c0_i32_0 : i32, i32
  }
  func.func @transform_5(%arg0: i32) -> (i32, i32) {
    %c0_i32 = arith.constant 0 : i32
    %c0_i32_0 = arith.constant 0 : i32
    return %arg0, %c0_i32 : i32, i32
  }
  func.func @transform_6(%arg0: i32) -> (i32, i32) {
    %c0_i32 = arith.constant 0 : i32
    %c0_i32_0 = arith.constant 0 : i32
    %c0_i32_1 = arith.constant 0 : i32
    return %c0_i32, %c0_i32_0 : i32, i32
  }
  func.func @transform_7(%arg0: i32) -> (i32, i32) {
    %c0_i32 = arith.constant 0 : i32
    %c0_i32_0 = arith.constant 0 : i32
    return %arg0, %c0_i32 : i32, i32
  }
  func.func @transform_8(%arg0: i32) -> (i32, i32) {
    %c0_i32 = arith.constant 0 : i32
    %c0_i32_0 = arith.constant 0 : i32
    %c0_i32_1 = arith.constant 0 : i32
    return %c0_i32, %c0_i32_0 : i32, i32
  }
  func.func @transform_9(%arg0: i32) -> (i32, i32) {
    %c0_i32 = arith.constant 0 : i32
    %c0_i32_0 = arith.constant 0 : i32
    return %arg0, %c0_i32 : i32, i32
  }
  func.func @transform_10(%arg0: i32) -> (i32, i32) {
    %c0_i32 = arith.constant 0 : i32
    %c0_i32_0 = arith.constant 0 : i32
    %c0_i32_1 = arith.constant 0 : i32
    return %c0_i32, %c0_i32_0 : i32, i32
  }
  func.func @transform_11(%arg0: i32) -> (i32, i32) {
    %c0_i32 = arith.constant 0 : i32
    %c0_i32_0 = arith.constant 0 : i32
    %c0_i32_1 = arith.constant 0 : i32
    return %c0_i32, %c0_i32_0 : i32, i32
  }
  func.func @transform_12(%arg0: i32) -> (i32, i32) {
    %c0_i32 = arith.constant 0 : i32
    %c0_i32_0 = arith.constant 0 : i32
    %c0_i32_1 = arith.constant 0 : i32
    return %c0_i32, %c0_i32_0 : i32, i32
  }
  func.func @transform_13(%arg0: i32) -> (i32, i32) {
    %c0_i32 = arith.constant 0 : i32
    %c0_i32_0 = arith.constant 0 : i32
    %c0_i32_1 = arith.constant 0 : i32
    return %c0_i32, %c0_i32_0 : i32, i32
  }
  func.func @transform_14(%arg0: i32) -> (i32, i32) {
    %c0_i32 = arith.constant 0 : i32
    %c0_i32_0 = arith.constant 0 : i32
    %c0_i32_1 = arith.constant 0 : i32
    return %c0_i32, %c0_i32_0 : i32, i32
  }
  func.func @transform_15(%arg0: i32) -> (i32, i32) {
    %c0_i32 = arith.constant 0 : i32
    %c0_i32_0 = arith.constant 0 : i32
    %c0_i32_1 = arith.constant 0 : i32
    return %c0_i32, %c0_i32_0 : i32, i32
  }
  func.func @transform_16(%arg0: i32) -> (i32, i32) {
    %c0_i32 = arith.constant 0 : i32
    %c0_i32_0 = arith.constant 0 : i32
    return %arg0, %c0_i32 : i32, i32
  }
}

module attributes {stable_mosaic.version = 11 : i64} {
  func.func @_dlrm_fused_kernel(%arg0: i32, %arg1: memref<8x13xf32, #tpu.memory_space<vmem>>, %arg2: memref<13x32xf32, #tpu.memory_space<vmem>>, %arg3: memref<1x32xf32, #tpu.memory_space<vmem>>, %arg4: memref<32x16xf32, #tpu.memory_space<vmem>>, %arg5: memref<1x16xf32, #tpu.memory_space<vmem>>, %arg6: memref<8x4xi32, #tpu.memory_space<vmem>>, %arg7: memref<50x16xf32, #tpu.memory_space<vmem>>, %arg8: memref<8x4xi32, #tpu.memory_space<vmem>>, %arg9: memref<60x16xf32, #tpu.memory_space<vmem>>, %arg10: memref<8x4xi32, #tpu.memory_space<vmem>>, %arg11: memref<70x16xf32, #tpu.memory_space<vmem>>, %arg12: memref<96x6xf32, #tpu.memory_space<vmem>>, %arg13: memref<22x32xf32, #tpu.memory_space<vmem>>, %arg14: memref<1x32xf32, #tpu.memory_space<vmem>>, %arg15: memref<32x128xf32, #tpu.memory_space<vmem>>, %arg16: memref<1x128xf32, #tpu.memory_space<vmem>>, %arg17: memref<8x128xf32, #tpu.memory_space<vmem>>) attributes {dimension_semantics = [#tpu.dimension_semantics<parallel>], iteration_bounds = array<i64: 2>, scalar_prefetch = 0 : i64, scratch_operands = 0 : i64, tpu.core_type = #tpu.core_type<tc>, window_params = [{transform_indices = @transform_0, window_bounds = array<i64: 8, 13>}, {pipeline_mode = #tpu.pipeline_mode<synchronous>, transform_indices = @transform_1, window_bounds = array<i64: 13, 32>}, {pipeline_mode = #tpu.pipeline_mode<synchronous>, transform_indices = @transform_2, window_bounds = array<i64: 1, 32>}, {pipeline_mode = #tpu.pipeline_mode<synchronous>, transform_indices = @transform_3, window_bounds = array<i64: 32, 16>}, {pipeline_mode = #tpu.pipeline_mode<synchronous>, transform_indices = @transform_4, window_bounds = array<i64: 1, 16>}, {transform_indices = @transform_5, window_bounds = array<i64: 8, 4>}, {pipeline_mode = #tpu.pipeline_mode<synchronous>, transform_indices = @transform_6, window_bounds = array<i64: 50, 16>}, {transform_indices = @transform_7, window_bounds = array<i64: 8, 4>}, {pipeline_mode = #tpu.pipeline_mode<synchronous>, transform_indices = @transform_8, window_bounds = array<i64: 60, 16>}, {transform_indices = @transform_9, window_bounds = array<i64: 8, 4>}, {pipeline_mode = #tpu.pipeline_mode<synchronous>, transform_indices = @transform_10, window_bounds = array<i64: 70, 16>}, {pipeline_mode = #tpu.pipeline_mode<synchronous>, transform_indices = @transform_11, window_bounds = array<i64: 96, 6>}, {pipeline_mode = #tpu.pipeline_mode<synchronous>, transform_indices = @transform_12, window_bounds = array<i64: 22, 32>}, {pipeline_mode = #tpu.pipeline_mode<synchronous>, transform_indices = @transform_13, window_bounds = array<i64: 1, 32>}, {pipeline_mode = #tpu.pipeline_mode<synchronous>, transform_indices = @transform_14, window_bounds = array<i64: 32, 128>}, {pipeline_mode = #tpu.pipeline_mode<synchronous>, transform_indices = @transform_15, window_bounds = array<i64: 1, 128>}, {transform_indices = @transform_16, window_bounds = array<i64: 8, 128>}]} {
    %c0 = arith.constant 0 : index
    %c0_0 = arith.constant 0 : index
    %0 = vector.load %arg1[%c0, %c0_0] : memref<8x13xf32, #tpu.memory_space<vmem>>, vector<8x13xf32>
    %c0_1 = arith.constant 0 : index
    %c0_2 = arith.constant 0 : index
    %1 = vector.load %arg2[%c0_1, %c0_2] : memref<13x32xf32, #tpu.memory_space<vmem>>, vector<13x32xf32>
    %2 = arith.truncf %0 : vector<8x13xf32> to vector<8x13xbf16>
    %3 = arith.truncf %1 : vector<13x32xf32> to vector<13x32xbf16>
    %cst = arith.constant dense<0.000000e+00> : vector<8x32xf32>
    %4 = tpu.matmul %2, %3, %cst {dimension_numbers = #tpu.dot_dimension_numbers<[1], [0], [0], [1], [0, 0, 1, 1], [], []>} : vector<8x13xbf16>, vector<13x32xbf16>, vector<8x32xf32> -> vector<8x32xf32>
    %c0_3 = arith.constant 0 : index
    %c0_4 = arith.constant 0 : index
    %5 = vector.load %arg3[%c0_3, %c0_4] : memref<1x32xf32, #tpu.memory_space<vmem>>, vector<1x32xf32>
    %6 = vector.broadcast %5 : vector<1x32xf32> to vector<8x32xf32>
    %7 = arith.addf %4, %6 : vector<8x32xf32>
    %cst_5 = arith.constant 0.000000e+00 : f32
    %8 = vector.broadcast %cst_5 : f32 to vector<8x32xf32>
    %9 = arith.maximumf %7, %8 : vector<8x32xf32>
    %c0_6 = arith.constant 0 : index
    %c0_7 = arith.constant 0 : index
    %10 = vector.load %arg4[%c0_6, %c0_7] : memref<32x16xf32, #tpu.memory_space<vmem>>, vector<32x16xf32>
    %11 = arith.truncf %9 : vector<8x32xf32> to vector<8x32xbf16>
    %12 = arith.truncf %10 : vector<32x16xf32> to vector<32x16xbf16>
    %cst_8 = arith.constant dense<0.000000e+00> : vector<8x16xf32>
    %13 = tpu.matmul %11, %12, %cst_8 {dimension_numbers = #tpu.dot_dimension_numbers<[1], [0], [0], [1], [0, 0, 1, 1], [], []>} : vector<8x32xbf16>, vector<32x16xbf16>, vector<8x16xf32> -> vector<8x16xf32>
    %c0_9 = arith.constant 0 : index
    %c0_10 = arith.constant 0 : index
    %14 = vector.load %arg5[%c0_9, %c0_10] : memref<1x16xf32, #tpu.memory_space<vmem>>, vector<1x16xf32>
    %15 = vector.broadcast %14 : vector<1x16xf32> to vector<8x16xf32>
    %16 = arith.addf %13, %15 : vector<8x16xf32>
    %cst_11 = arith.constant 0.000000e+00 : f32
    %17 = vector.broadcast %cst_11 : f32 to vector<8x16xf32>
    %18 = arith.maximumf %16, %17 : vector<8x16xf32>
    %c0_12 = arith.constant 0 : index
    %c0_13 = arith.constant 0 : index
    %19 = vector.load %arg6[%c0_12, %c0_13] : memref<8x4xi32, #tpu.memory_space<vmem>>, vector<8x4xi32>
    %20 = tpu.iota {dimensions = array<i32: 1>} : vector<8x50xi32>
    %cst_14 = arith.constant 0.000000e+00 : f32
    %21 = vector.broadcast %cst_14 : f32 to vector<8x50xf32>
    %22 = vector.extract_strided_slice %19 {offsets = [0, 0], sizes = [8, 1], strides = [1, 1]} : vector<8x4xi32> to vector<8x1xi32>
    %23 = vector.broadcast %22 : vector<8x1xi32> to vector<8x50xi32>
    %24 = arith.cmpi eq, %20, %23 : vector<8x50xi32>
    %25 = arith.extui %24 : vector<8x50xi1> to vector<8x50xi32>
    %26 = arith.sitofp %25 : vector<8x50xi32> to vector<8x50xf32>
    %27 = arith.addf %21, %26 : vector<8x50xf32>
    %28 = vector.extract_strided_slice %19 {offsets = [0, 1], sizes = [8, 1], strides = [1, 1]} : vector<8x4xi32> to vector<8x1xi32>
    %29 = vector.broadcast %28 : vector<8x1xi32> to vector<8x50xi32>
    %30 = arith.cmpi eq, %20, %29 : vector<8x50xi32>
    %31 = arith.extui %30 : vector<8x50xi1> to vector<8x50xi32>
    %32 = arith.sitofp %31 : vector<8x50xi32> to vector<8x50xf32>
    %33 = arith.addf %27, %32 : vector<8x50xf32>
    %34 = vector.extract_strided_slice %19 {offsets = [0, 2], sizes = [8, 1], strides = [1, 1]} : vector<8x4xi32> to vector<8x1xi32>
    %35 = vector.broadcast %34 : vector<8x1xi32> to vector<8x50xi32>
    %36 = arith.cmpi eq, %20, %35 : vector<8x50xi32>
    %37 = arith.extui %36 : vector<8x50xi1> to vector<8x50xi32>
    %38 = arith.sitofp %37 : vector<8x50xi32> to vector<8x50xf32>
    %39 = arith.addf %33, %38 : vector<8x50xf32>
    %40 = vector.extract_strided_slice %19 {offsets = [0, 3], sizes = [8, 1], strides = [1, 1]} : vector<8x4xi32> to vector<8x1xi32>
    %41 = vector.broadcast %40 : vector<8x1xi32> to vector<8x50xi32>
    %42 = arith.cmpi eq, %20, %41 : vector<8x50xi32>
    %43 = arith.extui %42 : vector<8x50xi1> to vector<8x50xi32>
    %44 = arith.sitofp %43 : vector<8x50xi32> to vector<8x50xf32>
    %45 = arith.addf %39, %44 : vector<8x50xf32>
    %c0_15 = arith.constant 0 : index
    %c0_16 = arith.constant 0 : index
    %46 = vector.load %arg7[%c0_15, %c0_16] : memref<50x16xf32, #tpu.memory_space<vmem>>, vector<50x16xf32>
    %47 = arith.truncf %45 : vector<8x50xf32> to vector<8x50xbf16>
    %48 = arith.truncf %46 : vector<50x16xf32> to vector<50x16xbf16>
    %cst_17 = arith.constant dense<0.000000e+00> : vector<8x16xf32>
    %49 = tpu.matmul %47, %48, %cst_17 {dimension_numbers = #tpu.dot_dimension_numbers<[1], [0], [0], [1], [0, 0, 1, 1], [], []>} : vector<8x50xbf16>, vector<50x16xbf16>, vector<8x16xf32> -> vector<8x16xf32>
    %c0_18 = arith.constant 0 : index
    %c0_19 = arith.constant 0 : index
    %50 = vector.load %arg8[%c0_18, %c0_19] : memref<8x4xi32, #tpu.memory_space<vmem>>, vector<8x4xi32>
    %51 = tpu.iota {dimensions = array<i32: 1>} : vector<8x60xi32>
    %cst_20 = arith.constant 0.000000e+00 : f32
    %52 = vector.broadcast %cst_20 : f32 to vector<8x60xf32>
    %53 = vector.extract_strided_slice %50 {offsets = [0, 0], sizes = [8, 1], strides = [1, 1]} : vector<8x4xi32> to vector<8x1xi32>
    %54 = vector.broadcast %53 : vector<8x1xi32> to vector<8x60xi32>
    %55 = arith.cmpi eq, %51, %54 : vector<8x60xi32>
    %56 = arith.extui %55 : vector<8x60xi1> to vector<8x60xi32>
    %57 = arith.sitofp %56 : vector<8x60xi32> to vector<8x60xf32>
    %58 = arith.addf %52, %57 : vector<8x60xf32>
    %59 = vector.extract_strided_slice %50 {offsets = [0, 1], sizes = [8, 1], strides = [1, 1]} : vector<8x4xi32> to vector<8x1xi32>
    %60 = vector.broadcast %59 : vector<8x1xi32> to vector<8x60xi32>
    %61 = arith.cmpi eq, %51, %60 : vector<8x60xi32>
    %62 = arith.extui %61 : vector<8x60xi1> to vector<8x60xi32>
    %63 = arith.sitofp %62 : vector<8x60xi32> to vector<8x60xf32>
    %64 = arith.addf %58, %63 : vector<8x60xf32>
    %65 = vector.extract_strided_slice %50 {offsets = [0, 2], sizes = [8, 1], strides = [1, 1]} : vector<8x4xi32> to vector<8x1xi32>
    %66 = vector.broadcast %65 : vector<8x1xi32> to vector<8x60xi32>
    %67 = arith.cmpi eq, %51, %66 : vector<8x60xi32>
    %68 = arith.extui %67 : vector<8x60xi1> to vector<8x60xi32>
    %69 = arith.sitofp %68 : vector<8x60xi32> to vector<8x60xf32>
    %70 = arith.addf %64, %69 : vector<8x60xf32>
    %71 = vector.extract_strided_slice %50 {offsets = [0, 3], sizes = [8, 1], strides = [1, 1]} : vector<8x4xi32> to vector<8x1xi32>
    %72 = vector.broadcast %71 : vector<8x1xi32> to vector<8x60xi32>
    %73 = arith.cmpi eq, %51, %72 : vector<8x60xi32>
    %74 = arith.extui %73 : vector<8x60xi1> to vector<8x60xi32>
    %75 = arith.sitofp %74 : vector<8x60xi32> to vector<8x60xf32>
    %76 = arith.addf %70, %75 : vector<8x60xf32>
    %c0_21 = arith.constant 0 : index
    %c0_22 = arith.constant 0 : index
    %77 = vector.load %arg9[%c0_21, %c0_22] : memref<60x16xf32, #tpu.memory_space<vmem>>, vector<60x16xf32>
    %78 = arith.truncf %76 : vector<8x60xf32> to vector<8x60xbf16>
    %79 = arith.truncf %77 : vector<60x16xf32> to vector<60x16xbf16>
    %cst_23 = arith.constant dense<0.000000e+00> : vector<8x16xf32>
    %80 = tpu.matmul %78, %79, %cst_23 {dimension_numbers = #tpu.dot_dimension_numbers<[1], [0], [0], [1], [0, 0, 1, 1], [], []>} : vector<8x60xbf16>, vector<60x16xbf16>, vector<8x16xf32> -> vector<8x16xf32>
    %c0_24 = arith.constant 0 : index
    %c0_25 = arith.constant 0 : index
    %81 = vector.load %arg10[%c0_24, %c0_25] : memref<8x4xi32, #tpu.memory_space<vmem>>, vector<8x4xi32>
    %82 = tpu.iota {dimensions = array<i32: 1>} : vector<8x70xi32>
    %cst_26 = arith.constant 0.000000e+00 : f32
    %83 = vector.broadcast %cst_26 : f32 to vector<8x70xf32>
    %84 = vector.extract_strided_slice %81 {offsets = [0, 0], sizes = [8, 1], strides = [1, 1]} : vector<8x4xi32> to vector<8x1xi32>
    %85 = vector.broadcast %84 : vector<8x1xi32> to vector<8x70xi32>
    %86 = arith.cmpi eq, %82, %85 : vector<8x70xi32>
    %87 = arith.extui %86 : vector<8x70xi1> to vector<8x70xi32>
    %88 = arith.sitofp %87 : vector<8x70xi32> to vector<8x70xf32>
    %89 = arith.addf %83, %88 : vector<8x70xf32>
    %90 = vector.extract_strided_slice %81 {offsets = [0, 1], sizes = [8, 1], strides = [1, 1]} : vector<8x4xi32> to vector<8x1xi32>
    %91 = vector.broadcast %90 : vector<8x1xi32> to vector<8x70xi32>
    %92 = arith.cmpi eq, %82, %91 : vector<8x70xi32>
    %93 = arith.extui %92 : vector<8x70xi1> to vector<8x70xi32>
    %94 = arith.sitofp %93 : vector<8x70xi32> to vector<8x70xf32>
    %95 = arith.addf %89, %94 : vector<8x70xf32>
    %96 = vector.extract_strided_slice %81 {offsets = [0, 2], sizes = [8, 1], strides = [1, 1]} : vector<8x4xi32> to vector<8x1xi32>
    %97 = vector.broadcast %96 : vector<8x1xi32> to vector<8x70xi32>
    %98 = arith.cmpi eq, %82, %97 : vector<8x70xi32>
    %99 = arith.extui %98 : vector<8x70xi1> to vector<8x70xi32>
    %100 = arith.sitofp %99 : vector<8x70xi32> to vector<8x70xf32>
    %101 = arith.addf %95, %100 : vector<8x70xf32>
    %102 = vector.extract_strided_slice %81 {offsets = [0, 3], sizes = [8, 1], strides = [1, 1]} : vector<8x4xi32> to vector<8x1xi32>
    %103 = vector.broadcast %102 : vector<8x1xi32> to vector<8x70xi32>
    %104 = arith.cmpi eq, %82, %103 : vector<8x70xi32>
    %105 = arith.extui %104 : vector<8x70xi1> to vector<8x70xi32>
    %106 = arith.sitofp %105 : vector<8x70xi32> to vector<8x70xf32>
    %107 = arith.addf %101, %106 : vector<8x70xf32>
    %c0_27 = arith.constant 0 : index
    %c0_28 = arith.constant 0 : index
    %108 = vector.load %arg11[%c0_27, %c0_28] : memref<70x16xf32, #tpu.memory_space<vmem>>, vector<70x16xf32>
    %109 = arith.truncf %107 : vector<8x70xf32> to vector<8x70xbf16>
    %110 = arith.truncf %108 : vector<70x16xf32> to vector<70x16xbf16>
    %cst_29 = arith.constant dense<0.000000e+00> : vector<8x16xf32>
    %111 = tpu.matmul %109, %110, %cst_29 {dimension_numbers = #tpu.dot_dimension_numbers<[1], [0], [0], [1], [0, 0, 1, 1], [], []>} : vector<8x70xbf16>, vector<70x16xbf16>, vector<8x16xf32> -> vector<8x16xf32>
    %112 = tpu.concatenate %49, %80, %80, %111, %111, %111 in 1 : vector<8x16xf32>, vector<8x16xf32>, vector<8x16xf32>, vector<8x16xf32>, vector<8x16xf32>, vector<8x16xf32> -> vector<8x96xf32>
    %113 = tpu.concatenate %18, %18, %49, %18, %49, %80 in 1 : vector<8x16xf32>, vector<8x16xf32>, vector<8x16xf32>, vector<8x16xf32>, vector<8x16xf32>, vector<8x16xf32> -> vector<8x96xf32>
    %114 = arith.mulf %112, %113 : vector<8x96xf32>
    %c0_30 = arith.constant 0 : index
    %c0_31 = arith.constant 0 : index
    %115 = vector.load %arg12[%c0_30, %c0_31] : memref<96x6xf32, #tpu.memory_space<vmem>>, vector<96x6xf32>
    %116 = arith.truncf %114 : vector<8x96xf32> to vector<8x96xbf16>
    %117 = arith.truncf %115 : vector<96x6xf32> to vector<96x6xbf16>
    %cst_32 = arith.constant dense<0.000000e+00> : vector<8x6xf32>
    %118 = tpu.matmul %116, %117, %cst_32 {dimension_numbers = #tpu.dot_dimension_numbers<[1], [0], [0], [1], [0, 0, 1, 1], [], []>} : vector<8x96xbf16>, vector<96x6xbf16>, vector<8x6xf32> -> vector<8x6xf32>
    %119 = tpu.concatenate %18, %118 in 1 : vector<8x16xf32>, vector<8x6xf32> -> vector<8x22xf32>
    %c0_33 = arith.constant 0 : index
    %c0_34 = arith.constant 0 : index
    %120 = vector.load %arg13[%c0_33, %c0_34] : memref<22x32xf32, #tpu.memory_space<vmem>>, vector<22x32xf32>
    %121 = arith.truncf %119 : vector<8x22xf32> to vector<8x22xbf16>
    %122 = arith.truncf %120 : vector<22x32xf32> to vector<22x32xbf16>
    %cst_35 = arith.constant dense<0.000000e+00> : vector<8x32xf32>
    %123 = tpu.matmul %121, %122, %cst_35 {dimension_numbers = #tpu.dot_dimension_numbers<[1], [0], [0], [1], [0, 0, 1, 1], [], []>} : vector<8x22xbf16>, vector<22x32xbf16>, vector<8x32xf32> -> vector<8x32xf32>
    %c0_36 = arith.constant 0 : index
    %c0_37 = arith.constant 0 : index
    %124 = vector.load %arg14[%c0_36, %c0_37] : memref<1x32xf32, #tpu.memory_space<vmem>>, vector<1x32xf32>
    %125 = vector.broadcast %124 : vector<1x32xf32> to vector<8x32xf32>
    %126 = arith.addf %123, %125 : vector<8x32xf32>
    %cst_38 = arith.constant 0.000000e+00 : f32
    %127 = vector.broadcast %cst_38 : f32 to vector<8x32xf32>
    %128 = arith.maximumf %126, %127 : vector<8x32xf32>
    %c0_39 = arith.constant 0 : index
    %c0_40 = arith.constant 0 : index
    %129 = vector.load %arg15[%c0_39, %c0_40] : memref<32x128xf32, #tpu.memory_space<vmem>>, vector<32x128xf32>
    %130 = arith.truncf %128 : vector<8x32xf32> to vector<8x32xbf16>
    %131 = arith.truncf %129 : vector<32x128xf32> to vector<32x128xbf16>
    %cst_41 = arith.constant dense<0.000000e+00> : vector<8x128xf32>
    %132 = tpu.matmul %130, %131, %cst_41 {dimension_numbers = #tpu.dot_dimension_numbers<[1], [0], [0], [1], [0, 0, 1, 1], [], []>} : vector<8x32xbf16>, vector<32x128xbf16>, vector<8x128xf32> -> vector<8x128xf32>
    %c0_42 = arith.constant 0 : index
    %c0_43 = arith.constant 0 : index
    %133 = vector.load %arg16[%c0_42, %c0_43] : memref<1x128xf32, #tpu.memory_space<vmem>>, vector<1x128xf32>
    %134 = vector.broadcast %133 : vector<1x128xf32> to vector<8x128xf32>
    %135 = arith.addf %132, %134 : vector<8x128xf32>
    %136 = arith.negf %135 : vector<8x128xf32>
    %137 = math.exp %136 : vector<8x128xf32>
    %cst_44 = arith.constant 1.000000e+00 : f32
    %138 = vector.broadcast %cst_44 : f32 to vector<8x128xf32>
    %139 = arith.addf %138, %137 : vector<8x128xf32>
    %140 = arith.divf %138, %139 : vector<8x128xf32>
    %c0_45 = arith.constant 0 : index
    %c0_46 = arith.constant 0 : index
    %141 = vector.load %arg17[%c0_45, %c0_46] : memref<8x128xf32, #tpu.memory_space<vmem>>, vector<8x128xf32>
    tpu.vector_store %arg17[%c0_45, %c0_46], %140 {strides = array<i32>} : memref<8x128xf32, #tpu.memory_space<vmem>>, vector<8x128xf32>,
    return
  }
  func.func @transform_0(%arg0: i32) -> (i32, i32) {
    %c0_i32 = arith.constant 0 : i32
    %c0_i32_0 = arith.constant 0 : i32
    return %arg0, %c0_i32 : i32, i32
  }
  func.func @transform_1(%arg0: i32) -> (i32, i32) {
    %c0_i32 = arith.constant 0 : i32
    %c0_i32_0 = arith.constant 0 : i32
    %c0_i32_1 = arith.constant 0 : i32
    return %c0_i32, %c0_i32_0 : i32, i32
  }
  func.func @transform_2(%arg0: i32) -> (i32, i32) {
    %c0_i32 = arith.constant 0 : i32
    %c0_i32_0 = arith.constant 0 : i32
    %c0_i32_1 = arith.constant 0 : i32
    return %c0_i32, %c0_i32_0 : i32, i32
  }
  func.func @transform_3(%arg0: i32) -> (i32, i32) {
    %c0_i32 = arith.constant 0 : i32
    %c0_i32_0 = arith.constant 0 : i32
    %c0_i32_1 = arith.constant 0 : i32
    return %c0_i32, %c0_i32_0 : i32, i32
  }
  func.func @transform_4(%arg0: i32) -> (i32, i32) {
    %c0_i32 = arith.constant 0 : i32
    %c0_i32_0 = arith.constant 0 : i32
    %c0_i32_1 = arith.constant 0 : i32
    return %c0_i32, %c0_i32_0 : i32, i32
  }
  func.func @transform_5(%arg0: i32) -> (i32, i32) {
    %c0_i32 = arith.constant 0 : i32
    %c0_i32_0 = arith.constant 0 : i32
    return %arg0, %c0_i32 : i32, i32
  }
  func.func @transform_6(%arg0: i32) -> (i32, i32) {
    %c0_i32 = arith.constant 0 : i32
    %c0_i32_0 = arith.constant 0 : i32
    %c0_i32_1 = arith.constant 0 : i32
    return %c0_i32, %c0_i32_0 : i32, i32
  }
  func.func @transform_7(%arg0: i32) -> (i32, i32) {
    %c0_i32 = arith.constant 0 : i32
    %c0_i32_0 = arith.constant 0 : i32
    return %arg0, %c0_i32 : i32, i32
  }
  func.func @transform_8(%arg0: i32) -> (i32, i32) {
    %c0_i32 = arith.constant 0 : i32
    %c0_i32_0 = arith.constant 0 : i32
    %c0_i32_1 = arith.constant 0 : i32
    return %c0_i32, %c0_i32_0 : i32, i32
  }
  func.func @transform_9(%arg0: i32) -> (i32, i32) {
    %c0_i32 = arith.constant 0 : i32
    %c0_i32_0 = arith.constant 0 : i32
    return %arg0, %c0_i32 : i32, i32
  }
  func.func @transform_10(%arg0: i32) -> (i32, i32) {
    %c0_i32 = arith.constant 0 : i32
    %c0_i32_0 = arith.constant 0 : i32
    %c0_i32_1 = arith.constant 0 : i32
    return %c0_i32, %c0_i32_0 : i32, i32
  }
  func.func @transform_11(%arg0: i32) -> (i32, i32) {
    %c0_i32 = arith.constant 0 : i32
    %c0_i32_0 = arith.constant 0 : i32
    %c0_i32_1 = arith.constant 0 : i32
    return %c0_i32, %c0_i32_0 : i32, i32
  }
  func.func @transform_12(%arg0: i32) -> (i32, i32) {
    %c0_i32 = arith.constant 0 : i32
    %c0_i32_0 = arith.constant 0 : i32
    %c0_i32_1 = arith.constant 0 : i32
    return %c0_i32, %c0_i32_0 : i32, i32
  }
  func.func @transform_13(%arg0: i32) -> (i32, i32) {
    %c0_i32 = arith.constant 0 : i32
    %c0_i32_0 = arith.constant 0 : i32
    %c0_i32_1 = arith.constant 0 : i32
    return %c0_i32, %c0_i32_0 : i32, i32
  }
  func.func @transform_14(%arg0: i32) -> (i32, i32) {
    %c0_i32 = arith.constant 0 : i32
    %c0_i32_0 = arith.constant 0 : i32
    %c0_i32_1 = arith.constant 0 : i32
    return %c0_i32, %c0_i32_0 : i32, i32
  }
  func.func @transform_15(%arg0: i32) -> (i32, i32) {
    %c0_i32 = arith.constant 0 : i32
    %c0_i32_0 = arith.constant 0 : i32
    %c0_i32_1 = arith.constant 0 : i32
    return %c0_i32, %c0_i32_0 : i32, i32
  }
  func.func @transform_16(%arg0: i32) -> (i32, i32) {
    %c0_i32 = arith.constant 0 : i32
    %c0_i32_0 = arith.constant 0 : i32
    return %arg0, %c0_i32 : i32, i32
  }
}

</mosaic_0001>

<bundles_post_ra>
// kernel: tpu_custom_call.1
= control target key start
LH: loop header
LB: loop body
LE: loop exit
PB: predicated region body
PF: predicated region fallthrough
CT: control target
= control target key end

     0   :  { %s2070_s0 = inlined_call_operand.vmem [shape: f32[16,13], index: 0, kind: input, shape index: {}]   ;;  %s2071_s1 = inlined_call_operand.vmem [shape: f32[13,32], index: 1, kind: input, shape index: {}]   ;;  %s2072_s2 = inlined_call_operand.vmem [shape: f32[1,32], index: 2, kind: input, shape index: {}]   ;;  %s2073_s3 = inlined_call_operand.vmem [shape: f32[32,16], index: 3, kind: input, shape index: {}]   ;;  %s2074_s4 = inlined_call_operand.vmem [shape: f32[1,16], index: 4, kind: input, shape index: {}]   ;;  %s2075_s5 = inlined_call_operand.vmem [shape: s32[16,4], index: 5, kind: input, shape index: {}]   ;;  %s2076_s6 = inlined_call_operand.vmem [shape: f32[50,16], index: 6, kind: input, shape index: {}]   ;;  %s2077_s7 = inlined_call_operand.vmem [shape: s32[16,4], index: 7, kind: input, shape index: {}]   ;;  %s2078_s8 = inlined_call_operand.vmem [shape: f32[60,16], index: 8, kind: input, shape index: {}]   ;;  %s2079_s9 = inlined_call_operand.vmem [shape: s32[16,4], index: 9, kind: input, shape index: {}]   ;;  %s2080_s10 = inlined_call_operand.vmem [shape: f32[70,16], index: 10, kind: input, shape index: {}]   ;;  %s2081_s11 = inlined_call_operand.vmem [shape: f32[96,6], index: 11, kind: input, shape index: {}]   ;;  %s2082_s12 = inlined_call_operand.vmem [shape: f32[22,32], index: 12, kind: input, shape index: {}]   ;;  %s2083_s13 = inlined_call_operand.vmem [shape: f32[1,32], index: 13, kind: input, shape index: {}]   ;;  %s2084_s14 = inlined_call_operand.vmem [shape: f32[32,128], index: 14, kind: input, shape index: {}]   ;;  %s2085_s15 = inlined_call_operand.vmem [shape: f32[1,128], index: 15, kind: input, shape index: {}]   ;;  %s2086_s16 = inlined_call_operand.hbm [shape: f32[16,128], index: 16, kind: output, shape index: {}]  }
   0x1   :  { %2092 = sst [smem:[#allocation8_spill]] %s2070_s0 }
   0x2   :  { %2093 = sst [smem:[#allocation9_spill]] %s2071_s1 }
   0x3   :  { %2094 = sst [smem:[#allocation10_spill]] %s2072_s2 }
   0x4   :  { %21 = vsyncpa [#allocation3], 0 }
   0x5   :  { %23 = vsyncpa [#allocation3 + $0x1], 0  ;;  %s1699_s21 = smov 0   ;;  %s1701_s22 = smov 0  }
   0x6   :  { %s1703_s23 = smov 0   ;;  %s1705_s24 = smov 0  }
   0x7 LB: > { %2095 = sst [smem:[#allocation5_spill]] %s1595_s23  ;;  %s1720_s25 = sadd.s32 4294967295, %s1599_s24   ;;  %s1599_s24 = sphi %s1705_s24, %s2105_s24   ;;  %s1595_s23 = sphi %s1703_s23, %s2110_s23   ;;  %s1591_s22 = sphi %s1701_s22, %s2109_s22   ;;  %s1587_s21 = sphi %s1699_s21, %s2108_s21  }
   0x8   : > { %s1315_s26 = sadd.s32 4294967294, %s1599_s24   ;;  %s1724_s27 = sadd.s32 1, %s1599_s24  }
   0x9   : > { %2096 = sst [smem:[#allocation6_spill]] %s1724_s27  ;;  %s392_s28 = sadd.s32 1, %s1595_s23 }
   0xa   : > { %s389_s29 = ssub.s32 %s1599_s24, %s1724_s27  ;;  %p402_p0 = scmp.ne.s32.totalorder %s1595_s23, %s1591_s22 }
   0xb   : > { %p390_p1 = scmp.eq.s32.totalorder %s389_s29, 0  ;;  %p403_p2 = scmp.eq.s32.totalorder %s1720_s25, 1 }
   0xc   : > { %p408_p3 = scmp.ne.s32.totalorder %s1591_s22, %s1587_s21  ;;  %p409_p4 = scmp.eq.s32.totalorder %s1315_s26, 1 }
   0xd   : > { %s1735_s30 = scalar_select %p390_p1, %s1595_s23, %s392_s28  }
   0xe   : > { %p1737_p5 = por %p403_p2, %p402_p0  ;;  %p1741_p6 = por %p409_p4, %p408_p3 }
   0xf   : > { %2097 = sst [smem:[#allocation7_spill]] %s1735_s30  ;;  %p1318_p7 = scmp.ge.s32.totalorder %s1599_s24, 1 }
  0x10   : > { %p491_p8 = scmp.lt.s32.totalorder %s1599_s24, 3 }
  0x12   : > { %p492_p9 = pnand %p1318_p7, %p491_p8 }
  0x13   : > { %s2100_s1 = sld [smem:[#allocation9_spill]] (!%p492_p9)  ;;  %vm585_vm0 = vcmask (!%p492_p9), 1045504   ;;  %vm586_vm1 = vcmask (!%p492_p9), 1046528   ;;  %v1601_v2 = vmov (!%p492_p9), 0.0   ;;  %p552_p10 = scmp.lt.s32.totalorder (!%p492_p9), %s1720_s25, 1  ;;  %v723_v4 = vld [vmem:[%s2076_s6] sm:$0xff] (!%p492_p9)  ;;  %v693_v35 = vlaneseq (!%p492_p9) }
  0x14   : > { %495 = sbr.rel (%p492_p9) target bundleno = 1410 (0x582), region = 84  ;;  %1387 = vmatprep.subr.bf16.mxu1 (!%p492_p9), %v1601_v2  ;;  %1401 = vmatprep.subr.bf16.mxu0 (!%p492_p9), %v1601_v2  ;;  %v724_v5 = vld [vmem:[%s2076_s6 + $0x8] sm:$0xff] (!%p492_p9)  ;;  %v1602_v6 = vmov (!%p492_p9), 65535   ;;  %vm1603_vm2 = vmmov (!%p492_p9), 0   ;;  %v1604_v9 = vmov (!%p492_p9), 2   ;;  %v1605_v10 = vmov (!%p492_p9), 0  }
  0x15   : > { %v587_v7 = vsel (!%p492_p9), %vm585_vm0, 4294967295, %v1602_v6  ;;  %1389 = vmatprep.mubr.msk.bf16.mxu1 (!%p492_p9), %vm1603_vm2, %v1601_v2  ;;  %1409 = vmatprep.mubr.msk.bf16.mxu0 (!%p492_p9), %vm1603_vm2, %v1601_v2  ;;  %v731_v11 = vpack.c.bf16 (!%p492_p9), %v724_v5, %v723_v4  ;;  %s2101_s18 = sld [smem:[#allocation8_spill]] (!%p492_p9)  ;;  %vm581_vm3 = vcmask (!%p492_p9), 105472   ;;  %v725_v16 = vld [vmem:[%s2076_s6 + $0x10] sm:$0xff] (!%p492_p9)  ;;  %v726_v17 = vld [vmem:[%s2076_s6 + $0x18] sm:$0xff] (!%p492_p9)  ;;  %v1606_v19 = vmov (!%p492_p9), 3  }
  0x16   : > { %v588_v8 = vsel (!%p492_p9), %vm586_vm1, %v587_v7, 0  ;;  %1524 = vset.pattern.permute.xlu1 (!%p492_p9), %v1604_v9  ;;  %1522 = vset.pattern.permute.xlu0 (!%p492_p9), %v1605_v10  ;;  %v732_v18 = vpack.c.bf16 (!%p492_p9), %v726_v17, %v725_v16  ;;  %v1607_v20 = vmov (!%p492_p9), 1   ;;  %v727_v23 = vld [vmem:[%s2076_s6 + $0x20] sm:$0xff] (!%p492_p9)  ;;  %v728_v24 = vld [vmem:[%s2076_s6 + $0x28] sm:$0xff] (!%p492_p9)  ;;  %v729_v25 = vld [vmem:[%s2076_s6 + $0x30] sm:$0x3] (!%p492_p9) }
  0x17   : > { %1402 = vmatpush3.bf16.msra.mxu0 (!%p492_p9), %v731_v11  ;;  %v733_v26 = vpack.c.bf16 (!%p492_p9), %v728_v24, %v727_v23  ;;  %v734_v27 = vpack.c.bf16 (!%p492_p9), %v729_v25, %v729_v25  ;;  %vm739_vm4 = vcmask (!%p492_p9), 1040384   ;;  %v633_v29 = vld [vmem:[%s2073_s3] sm:$0xff] (!%p492_p9)  ;;  %v634_v30 = vld [vmem:[%s2073_s3 + $0x8] sm:$0xff] (!%p492_p9)  ;;  %v635_v32 = vld [vmem:[%s2073_s3 + $0x10] sm:$0xff] (!%p492_p9)  ;;  %v1822_v36 = vand.u32 (!%p492_p9), 127, %v693_v35  ;;  %s2102_s2 = sld [smem:[#allocation10_spill]] (!%p492_p9) }
  0x18   : > { %1403 = vmatprep.subr.bf16.mxu0 (!%p492_p9), %v1601_v2  ;;  %v638_v31 = vpack.c.bf16 (!%p492_p9), %v634_v30, %v633_v29  ;;  %v636_v33 = vld [vmem:[%s2073_s3 + $0x18] sm:$0xff] (!%p492_p9)  ;;  %v901_v49 = vld [vmem:[%s2080_s10] sm:$0xff] (!%p492_p9)  ;;  %v902_v50 = vld [vmem:[%s2080_s10 + $0x8] sm:$0xff] (!%p492_p9)  ;;  %vm735_vm11 = vcmask (!%p492_p9), 408576   ;;  %s1609_s28 = smov (!%p492_p9), 64   ;;  %s2091_s29 = smov (!%p492_p9), 48  }
  0x19   : > { %v570_v0 = vld [vmem:[%s2100_s1] sm:$0xff] (!%p492_p9)  ;;  %v571_v1 = vld [vmem:[%s2100_s1 + $0x8] sm:$0x1f] (!%p492_p9)  ;;  %v741_v28 = vsel (!%p492_p9), %vm739_vm4, %v734_v27, 0  ;;  %v639_v34 = vpack.c.bf16 (!%p492_p9), %v636_v33, %v635_v32  ;;  %v911_v55 = vpack.c.bf16 (!%p492_p9), %v902_v50, %v901_v49  ;;  %v903_v57 = vld [vmem:[%s2080_s10 + $0x10] sm:$0xff] (!%p492_p9)  ;;  %s2104_s1 = smov (!%p492_p9), 32  }
  0x1a   : > { %v573_v3 = vpack.c.bf16 (!%p492_p9), %v571_v1, %v570_v0  ;;  %v904_v58 = vld [vmem:[%s2080_s10 + $0x18] sm:$0xff] (!%p492_p9)  ;;  %v905_v0 = vld [vmem:[%s2080_s10 + $0x20] sm:$0xff] (!%p492_p9)  ;;  %v906_v1 = vld [vmem:[%s2080_s10 + $0x28] sm:$0xff] (!%p492_p9) }
  0x1b   : > { %s553_s20 = scalar_select %p552_p10, %s1720_s25, 1  ;;  %1404 = vmatpush3.bf16.msra.mxu0 %v732_v18  ;;  %v912_v62 = vpack.c.bf16 %v904_v58, %v903_v57  ;;  %v913_v6 = vpack.c.bf16 %v906_v1, %v905_v0  ;;  %v813_v29 = vld [vmem:[%s2078_s8 + $0x8] sm:$0xff]  ;;  %v814_v35 = vld [vmem:[%s2078_s8 + $0x10] sm:$0xff]  ;;  %v1016_v58 = vld [vmem:[%s2081_s11 + $0x18] sm:$0xff] }
  0x1c   : > { %v590_v12 = vand.u32 %v588_v8, %v573_v3  ;;  %1405 = vmatprep.subr.bf16.mxu0 %v1601_v2  ;;  %v907_v8 = vld [vmem:[%s2080_s10 + $0x30] sm:$0xff] }
  0x1d   : > { %s1768_s26 = sshll.u32 %s553_s20, 3  ;;  %v1324_v24 = vld [vmem:[%s2102_s2] ss:$0 sm:$0xff]  ;;  %s2090_s20 = smov 32   ;;  %v1015_v57 = vld [vmem:[%s2081_s11 + $0x10] sm:$0xff] }
  0x1e   : > { %1388 = vmatpush3.bf16.msra.mxu1 %v590_v12  ;;  %s555_s19 = scalar_lea.vmem %s2101_s18, %s1768_s26  ;;  %s559_s23 = scalar_lea.vmem %s2075_s5, %s1768_s26 }
  0x1f   : > { %v569_v13 = vld [vmem:[%s555_s19] sm:$0xff]  ;;  %1393 = vmatprep.subr.bf16.mxu1 %v1601_v2  ;;  %s563_s30 = scalar_lea.vmem %s2077_s7, %s1768_s26  ;;  %s567_s19 = scalar_lea.vmem %s2079_s9, %s1768_s26  ;;  %1406 = vmatpush3.bf16.msra.mxu0 %v733_v26 }
  0x20   : > { %v692_v14 = vld [vmem:[%s559_s23] sm:$0xff]  ;;  %v572_v15 = vpack.c.bf16 %v569_v13, %v569_v13  ;;  %1407 = vmatprep.subr.bf16.mxu0 %v1601_v2  ;;  %s2103_s26 = smov 48  }
  0x21   : > { %710 = vperm.xlu1 %1524, %v692_v14   ;;  %696 = vperm.xlu0 %1522, %v692_v14   ;;  %v783_v21 = vld [vmem:[%s563_s30] sm:$0xff] }
  0x22   : > { %1390 = vmatmul.mubr.msk.bf16.vlgmr.msra.gmra.mrb[0].mxu1 %vm581_vm3, %v572_v15  ;;  %v872_v22 = vld [vmem:[%s567_s19] sm:$0xff]  ;;  %vm920_vm3 = vcmask 1042432   ;;  %s1611_s19 = smov 16  }
  0x23   : > { %1397 = vmatprep.mubr.msk.bf16.mxu1 %vm1603_vm2, %v1601_v2  ;;  %1408 = vmatpush3.bf16.msra.mxu0 %v741_v28  ;;  %v812_v28 = vld [vmem:[%s2078_s8] sm:$0xff] }
  0x24   : > { %1425 = vmatprep.subr.bf16.mxu0 %v1601_v2  ;;  %1394 = vmatpush3.bf16.msra.mxu1 %v638_v31  ;;  %v821_v33 = vpack.c.bf16 %v813_v29, %v812_v28 }
  0x25   : > { %1525 = vset.pattern.permute.xlu1 %v1606_v19  ;;  %1523 = vset.pattern.permute.xlu0 %v1607_v20 }
  0x26   : > { %717 = vperm.xlu1 %1525, %v692_v14   ;;  %703 = vperm.xlu0 %1523, %v692_v14  }
  0x27   : > { %1395 = vmatprep.subr.bf16.mxu1 %v1601_v2 }
  0x28   : > { %1396 = vmatpush3.bf16.msra.mxu1 %v639_v34 }
  0x29   : > { %1413 = vmatprep.subr.bf16.mxu1 %v1601_v2 }
  0x2a   : > { %1526 = vset.pattern.permute.xlu1 %v1605_v10  ;;  %792 = vperm.xlu0 %1523, %v783_v21  }
  0x2b   : > { %785 = vperm.xlu1 %1526, %v783_v21  }
  0x2e   : > { %1528 = vset.pattern.permute.xlu0 %v1605_v10  ;;  %v909_v10 = vld [vmem:[%s2080_s10 + $0x40] sm:$0x3f] }
  0x2f   : > { %1527 = vset.pattern.permute.xlu1 %v1604_v9  ;;  %874 = vperm.xlu0 %1528, %v872_v22   ;;  %v915_v15 = vpack.c.bf16 %v909_v10, %v909_v10  ;;  %v1021_v10 = vld [vmem:[%s2081_s11 + $0x40] sm:$0xff] }
  0x30   : > { %799 = vperm.xlu1 %1527, %v783_v21  }
  0x33   : > { %1531 = vset.pattern.permute.xlu0 %v1604_v9  ;;  %v908_v9 = vld [vmem:[%s2080_s10 + $0x38] sm:$0xff] }
  0x34   : > { %1529 = vset.pattern.permute.xlu1 %v1607_v20  ;;  %888 = vperm.xlu0 %1531, %v872_v22   ;;  %v914_v14 = vpack.c.bf16 %v908_v9, %v907_v8  ;;  %v922_v20 = vsel %vm920_vm3, %v915_v15, 0  ;;  %v1020_v8 = vld [vmem:[%s2081_s11 + $0x38] sm:$0xff] }
  0x35   : > { %881 = vperm.xlu1 %1529, %v872_v22  }
  0x38   : > { %1532 = vset.pattern.permute.xlu0 %v1606_v19 }
  0x39   : > { %1530 = vset.pattern.permute.xlu1 %v1606_v19 }
  0x3a   : > { %806 = vperm.xlu1 %1530, %v783_v21  }
  0x3e   : > { %895 = vperm.xlu1 %1530, %v872_v22  }
  0xa0   : > { %v711_v37 = vpop.permute.xlu1 %710  ;;  %v697_v38 = vpop.permute.xlu0 %696 }
  0xa1   : > { %vm698_vm5 = vcmp.eq.s32.totalorder %v1822_v36, %v697_v38  ;;  %vm712_vm6 = vcmp.eq.s32.totalorder %v1822_v36, %v711_v37  ;;  %v816_v38 = vld [vmem:[%s2078_s8 + $0x20] sm:$0xff] }
  0xa2   : > { %v1328_v39 = vsel %vm698_vm5, 1.0, %v1601_v2  ;;  %v1330_v42 = vsel %vm712_vm6, 1.0, %v1601_v2  ;;  %vm916_vm5 = vcmask 572416   ;;  %vm647_vm6 = vcmask 261120  }
  0xa5   : > { %v718_v40 = vpop.permute.xlu1 %717  ;;  %v704_v41 = vpop.permute.xlu0 %703 }
  0xa6   : > { %vm719_vm7 = vcmp.eq.s32.totalorder %v1822_v36, %v718_v40  ;;  %vm705_vm8 = vcmp.eq.s32.totalorder %v1822_v36, %v704_v41  ;;  %v818_v40 = vld [vmem:[%s2078_s8 + $0x30] sm:$0xff]  ;;  %v819_v41 = vld [vmem:[%s2078_s8 + $0x38] sm:$0xf] }
  0xa7   : > { %v1329_v43 = vsel %vm705_vm8, 1.0, %v1601_v2  ;;  %v1331_v45 = vsel %vm719_vm7, 1.0, %v1601_v2  ;;  %vm825_vm7 = vcmask 490496   ;;  %vm984_vm8 = vcmask 392192  }
  0xa8   : > { %v708_v44 = vadd.f32 %v1329_v43, %v1328_v39  ;;  %v817_v39 = vld [vmem:[%s2078_s8 + $0x28] sm:$0xff]  ;;  %v824_v43 = vpack.c.bf16 %v819_v41, %v818_v40 }
  0xa9   : > { %v793_v46 = vpop.permute.xlu0 %792 }
  0xaa   : > { %v715_v47 = vadd.f32 %v1330_v42, %v708_v44  ;;  %v786_v48 = vpop.permute.xlu1 %785  ;;  %vm794_vm9 = vcmp.eq.s32.totalorder %v1822_v36, %v793_v46  ;;  %v823_v42 = vpack.c.bf16 %v817_v39, %v816_v38  ;;  %v830_v44 = vsel %vm585_vm0, %v824_v43, 0  ;;  %v1082_v43 = vld [vmem:[%s2082_s12 + $0x8] sm:$0xff] }
  0xab   : > { %vm787_vm10 = vcmp.eq.s32.totalorder %v1822_v36, %v786_v48  ;;  %v1334_v51 = vsel %vm794_vm9, 1.0, %v1601_v2  ;;  %vm981_vm0 = vcmask 130048   ;;  %vm986_vm9 = vcmask 523264  }
  0xac   : > { %v722_v52 = vadd.f32 %v1331_v45, %v715_v47  ;;  %v1333_v53 = vsel %vm787_vm10, 1.0, %v1601_v2  ;;  %vm988_vm10 = vcmask 654336  }
  0xad   : > { %v797_v54 = vadd.f32 %v1334_v51, %v1333_v53 }
  0xae   : > { %v730_v56 = vpack.c.bf16 %v722_v52, %v722_v52  ;;  %v875_v59 = vpop.permute.xlu0 %874 }
  0xaf   : > { %v800_v60 = vpop.permute.xlu1 %799  ;;  %vm876_vm13 = vcmp.eq.s32.totalorder %v1822_v36, %v875_v59  ;;  %v1027_v59 = vpack.c.bf16 %v1016_v58, %v1015_v57  ;;  %v1144_v58 = vld [vmem:[%s2084_s14 + $0x10] sm:$0xff] }
  0xb0   : > { %vm801_vm12 = vcmp.eq.s32.totalorder %v1822_v36, %v800_v60  ;;  %1410 = vmatmul.mubr.msk.bf16.vlgmr.msra.gmra.mrb[0].mxu0 %vm735_vm11, %v730_v56  ;;  %v1338_v5 = vsel %vm876_vm13, 1.0, %v1601_v2  ;;  %v1017_v60 = vld [vmem:[%s2081_s11 + $0x20] sm:$0xff]  ;;  %vm1032_vm11 = vcmask 785408  }
  0xb1   : > { %v1335_v61 = vsel %vm801_vm12, 1.0, %v1601_v2  ;;  %1426 = vmatpush3.bf16.msra.mxu0 %v911_v55  ;;  %1435 = vmatprep.mubr.msk.bf16.mxu0 %vm1603_vm2, %v1601_v2  ;;  %v1014_v55 = vld [vmem:[%s2081_s11 + $0x8] sm:$0xff]  ;;  %vm1094_vm12 = vcmask 179200  }
  0xb2   : > { %v804_v63 = vadd.f32 %v1335_v61, %v797_v54  ;;  %1427 = vmatprep.subr.bf16.mxu0 %v1601_v2  ;;  %v1013_v54 = vld [vmem:[%s2081_s11] sm:$0xff]  ;;  %v1018_v61 = vld [vmem:[%s2081_s11 + $0x28] sm:$0xff] }
  0xb3   : > { %v889_v3 = vpop.permute.xlu0 %888  ;;  %v1026_v56 = vpack.c.bf16 %v1014_v55, %v1013_v54 }
  0xb4   : > { %v882_v4 = vpop.permute.xlu1 %881  ;;  %vm890_vm15 = vcmp.eq.s32.totalorder %v1822_v36, %v889_v3 }
  0xb5   : > { %vm883_vm14 = vcmp.eq.s32.totalorder %v1822_v36, %v882_v4  ;;  %1428 = vmatpush3.bf16.msra.mxu0 %v912_v62  ;;  %v1340_v13 = vsel %vm890_vm15, 1.0, %v1601_v2  ;;  %v1326_v62 = vld [vmem:[%s2074_s4] ss:$0 sm:$0xff] }
  0xb6   : > { %v1339_v7 = vsel %vm883_vm14, 1.0, %v1601_v2  ;;  %1429 = vmatprep.subr.bf16.mxu0 %v1601_v2 }
  0xb7   : > { %v886_v11 = vadd.f32 %v1339_v7, %v1338_v5  ;;  %v1019_v7 = vld [vmem:[%s2081_s11 + $0x30] sm:$0xff] }
  0xb8   : > { %v1029_v9 = vpack.c.bf16 %v1020_v8, %v1019_v7 }
  0xb9   : > { %v807_v12 = vpop.permute.xlu1 %806  ;;  %1430 = vmatpush3.bf16.msra.mxu0 %v913_v6  ;;  %v893_v18 = vadd.f32 %v1340_v13, %v886_v11  ;;  %v1022_v11 = vld [vmem:[%s2081_s11 + $0x48] sm:$0xff]  ;;  %v1023_v13 = vld [vmem:[%s2081_s11 + $0x50] sm:$0xff] }
  0xba   : > { %vm808_vm1 = vcmp.eq.s32.totalorder %v1822_v36, %v807_v12  ;;  %1431 = vmatprep.subr.bf16.mxu0 %v1601_v2  ;;  %v1030_v12 = vpack.c.bf16 %v1022_v11, %v1021_v10 }
  0xbb   : > { %v1336_v16 = vsel %vm808_vm1, 1.0, %v1601_v2 }
  0xbc   : > { %v811_v17 = vadd.f32 %v1336_v16, %v804_v63  ;;  %v1028_v63 = vpack.c.bf16 %v1018_v61, %v1017_v60  ;;  %v1344_v61 = vld [vmem:[%s2083_s13] ss:$0 sm:$0xff] }
  0xbd   : > { %v896_v19 = vpop.permute.xlu1 %895  ;;  %1432 = vmatpush3.bf16.msra.mxu0 %v914_v14  ;;  %v1024_v14 = vld [vmem:[%s2081_s11 + $0x58] sm:$0xff] }
  0xbe   : > { %vm897_vm4 = vcmp.eq.s32.totalorder %v1822_v36, %v896_v19  ;;  %1433 = vmatprep.subr.bf16.mxu0 %v1601_v2  ;;  %v815_v36 = vld [vmem:[%s2078_s8 + $0x18] sm:$0xff]  ;;  %v820_v45 = vpack.c.bf16 %v811_v17, %v811_v17  ;;  %v1031_v15 = vpack.c.bf16 %v1024_v14, %v1023_v13 }
  0xbf   : > { %v1341_v21 = vsel %vm897_vm4, 1.0, %v1601_v2  ;;  %v822_v37 = vpack.c.bf16 %v815_v36, %v814_v35 }
  0xc0   : > { %v900_v22 = vadd.f32 %v1341_v21, %v893_v18 }
  0xc1   : > { %1434 = vmatpush3.bf16.msra.mxu0 %v922_v20 }
  0xc2   : > { %v910_v23 = vpack.c.bf16 %v900_v22, %v900_v22  ;;  %1455 = vmatprep.subr.bf16.mxu0 %v1601_v2 }
  0xc4   : > { %1436 = vmatmul.mubr.msk.bf16.vlgmr.msra.gmra.mrb[4].mxu0 %vm916_vm5, %v910_v23 }
  0xc5   : > { %1459 = vmatprep.mubr.msk.bf16.mxu0 %vm1603_vm2, %v1601_v2 }
  0xf5   : > { %v626_v25 = vpop.f32.mrb[0].mxu1 }
  0xf6   : > { %v627_v26 = vadd.f32 %v1324_v24, %v626_v25  ;;  %v1391_v27 = vpop.f32.mrb[1].mxu1 }
  0xf7   : > { %v629_v30 = vpop.f32.mrb[2].mxu1 }
  0xf8   : > { %v632_v31 = vmax.f32 %v627_v26, 0.0  ;;  %v1392_v32 = vpop.f32.mrb[3].mxu1 }
  0xfa   : > { %v637_v34 = vpack.c.bf16 %v632_v31, %v632_v31 }
  0xfc   : > { %1398 = vmatmul.mubr.msk.bf16.vlgmr.msra.gmra.mrb[4].mxu1 %vm647_vm6, %v637_v34 }
  0xfd   : > { %1414 = vmatpush3.bf16.msra.mxu1 %v821_v33  ;;  %1421 = vmatprep.mubr.msk.bf16.mxu1 %vm1603_vm2, %v1601_v2 }
  0xfe   : > { %1415 = vmatprep.subr.bf16.mxu1 %v1601_v2 }
 0x101   : > { %1416 = vmatpush3.bf16.msra.mxu1 %v822_v37 }
 0x102   : > { %1417 = vmatprep.subr.bf16.mxu1 %v1601_v2 }
 0x105   : > { %1418 = vmatpush3.bf16.msra.mxu1 %v823_v42  ;;  %v1081_v42 = vld [vmem:[%s2082_s12] sm:$0xff] }
 0x106   : > { %1419 = vmatprep.subr.bf16.mxu1 %v1601_v2 }
 0x109   : > { %1420 = vmatpush3.bf16.msra.mxu1 %v830_v44  ;;  %v1083_v44 = vld [vmem:[%s2082_s12 + $0x10] sm:$0x3f] }
 0x10a   : > { %1439 = vmatprep.subr.bf16.mxu1 %v1601_v2 }
 0x10c   : > { %1422 = vmatmul.mubr.msk.bf16.vlgmr.msra.gmra.mrb[8].mxu1 %vm825_vm7, %v820_v45  ;;  %v1085_v45 = vpack.c.bf16 %v1082_v43, %v1081_v42 }
 0x10d   : > { %1451 = vmatprep.mubr.msk.bf16.mxu1 %vm1603_vm2, %v1601_v2  ;;  %1440 = vmatpush3.bf16.msra.mxu1 %v1026_v56 }
 0x10e   : > { %1441 = vmatprep.subr.bf16.mxu1 %v1601_v2  ;;  %1456 = vmatpush3.bf16.msra.mxu0 %v1085_v45 }
 0x10f   : > { %1457 = vmatprep.subr.bf16.mxu0 %v1601_v2 }
 0x111   : > { %1442 = vmatpush3.bf16.msra.mxu1 %v1027_v59  ;;  %v1145_v59 = vld [vmem:[%s2084_s14 + $0x18] sm:$0xff] }
 0x112   : > { %1443 = vmatprep.subr.bf16.mxu1 %v1601_v2  ;;  %v1148_v60 = vpack.c.bf16 %v1145_v59, %v1144_v58 }
 0x115   : > { %1444 = vmatpush3.bf16.msra.mxu1 %v1028_v63 }
 0x116   : > { %1445 = vmatprep.subr.bf16.mxu1 %v1601_v2 }
 0x119   : > { %1446 = vmatpush3.bf16.msra.mxu1 %v1029_v9 }
 0x11a   : > { %1447 = vmatprep.subr.bf16.mxu1 %v1601_v2 }
 0x11d   : > { %1448 = vmatpush3.bf16.msra.mxu1 %v1030_v12 }
 0x11e   : > { %1449 = vmatprep.subr.bf16.mxu1 %v1601_v2 }
 0x121   : > { %1450 = vmatpush3.bf16.msra.mxu1 %v1031_v15 }
 0x183   : > { %v1922_v46 = vpop.f32.mrb[0].mxu0 }
 0x184   : > { %995 = vrot.lane.b32.xlu0 %v1922_v46, %s2090_s20  ;;  %v1411_v47 = vpop.f32.mrb[1].mxu0 }
 0x185   : > { %v780_v48 = vpop.f32.mrb[2].mxu0 }
 0x186   : > { %v1412_v49 = vpop.f32.mrb[3].mxu0 }
 0x188   : > { %1001 = vrot.lane.b32.xlu0 %v1922_v46, %s1609_s28 }
 0x197   : > { %v958_v50 = vpop.f32.mrb[4].mxu0 }
 0x198   : > { %972 = vrot.lane.b32.xlu1 %v958_v50, %s2091_s29  ;;  %v1437_v51 = vpop.f32.mrb[5].mxu0 }
 0x199   : > { %v961_v52 = vpop.f32.mrb[6].mxu0 }
 0x19a   : > { %v1438_v53 = vpop.f32.mrb[7].mxu0  ;;  %v1142_v52 = vld [vmem:[%s2084_s14] sm:$0xff] }
 0x19b   : > { %v1143_v53 = vld [vmem:[%s2084_s14 + $0x8] sm:$0xff] }
 0x19c   : > { %975 = vrot.lane.b32.xlu1 %v958_v50, %s1609_s28  ;;  %s1612_s28 = smov 80   ;;  %v1147_v56 = vpack.c.bf16 %v1143_v53, %v1142_v52 }
 0x1cf   : > { %v685_v0 = vpop.f32.mrb[4].mxu1 }
 0x1d0   : > { %v686_v1 = vadd.f32 %v1326_v62, %v685_v0  ;;  %v1399_v3 = vpop.f32.mrb[5].mxu1 }
 0x1d1   : > { %v688_v4 = vpop.f32.mrb[6].mxu1 }
 0x1d2   : > { %v1951_v5 = vmax.f32 %v686_v1, 0.0  ;;  %v1400_v6 = vpop.f32.mrb[7].mxu1 }
 0x1d4   : > { %991 = vrot.lane.b32.xlu0 %v1951_v5, %s1611_s19 }
 0x1d8   : > { %998 = vrot.lane.b32.xlu0 %v1951_v5, %s2103_s26 }
 0x1df   : > { %v866_v16 = vpop.f32.mrb[8].mxu1 }
 0x1e0   : > { %1004 = vrot.lane.b32.xlu0 %v866_v16, %s1612_s28  ;;  %965 = vrot.lane.b32.xlu1 %v866_v16, %s1611_s19  ;;  %v1423_v17 = vpop.f32.mrb[9].mxu1 }
 0x1e1   : > { %v869_v18 = vpop.f32.mrb[10].mxu1 }
 0x1e2   : > { %v1424_v19 = vpop.f32.mrb[11].mxu1 }
 0x1e4   : > { %968 = vrot.lane.b32.xlu1 %v866_v16, %s2104_s1  ;;  %s549_s1 = sand.u32 1, %s1591_s22  }
 0x1e5   : > { %s1319_s23 = sshll.u32 %s549_s1, 3  ;;  %s1207_s18 = scalar_lea.sflag [#allocation3], %s549_s1 }
 0x1e6   : > { %s551_s30 = scalar_lea.vmem [#allocation2], %s1319_s23 }
 0x1e7   : > { %s1220_s26 = sshll.u32 %s551_s30, 4  ;;  %s2030_s26 = int_to_ptr.vmem [resolvable:$true] %s1220_s26 }
 0x1e8   : > { %978 = vrot.lane.b32.xlu1 %v958_v50, %s1612_s28  ;;  %s1537_s28 = scalar_lea.vmem %s2030_s26, 128 }
 0x1e9   : > { %p1538_p11 = scmp.ne.s32.totalorder %s2030_s26, %s1537_s28 }
 0x1eb   : > { %p1539_p12 = pnand %p1538_p11, %p1737_p5 }
 0x1ed   : > { %p1540_p13 = pneg %p1539_p12 }
 0x1f6   : > { %v996_v20 = vpop.permute.xlu0 %995 }
 0x1fa   : > { %v1002_v22 = vpop.permute.xlu0 %1001 }
 0x20a   : > { %v973_v21 = vpop.permute.xlu1 %972 }
 0x20e   : > { %v976_v23 = vpop.permute.xlu1 %975 }
 0x246   : > { %v992_v24 = vpop.permute.xlu0 %991 }
 0x247   : > { %v1007_v26 = vsel %vm981_vm0, %v1951_v5, %v992_v24 }
 0x248   : > { %v1008_v28 = vsel %vm647_vm6, %v1007_v26, %v996_v20 }
 0x24a   : > { %v999_v27 = vpop.permute.xlu0 %998 }
 0x24b   : > { %v1009_v31 = vsel %vm984_vm8, %v1008_v28, %v999_v27 }
 0x24c   : > { %v1010_v36 = vsel %vm986_vm9, %v1009_v31, %v1002_v22 }
 0x252   : > { %v966_v25 = vpop.permute.xlu1 %965  ;;  %v1005_v33 = vpop.permute.xlu0 %1004 }
 0x253   : > { %v982_v29 = vsel %vm981_vm0, %v1922_v46, %v966_v25  ;;  %v1011_v38 = vsel %vm988_vm10, %v1010_v36, %v1005_v33  ;;  %v1086_v46 = vpack.c.bf16 %v1083_v44, %v1083_v44 }
 0x255   : > { %v1099_v47 = vsel %vm920_vm3, %v1086_v46, 0 }
 0x256   : > { %v969_v30 = vpop.permute.xlu1 %968  ;;  %1458 = vmatpush3.bf16.msra.mxu0 %v1099_v47 }
 0x257   : > { %v983_v32 = vsel %vm647_vm6, %v982_v29, %v969_v30  ;;  %1463 = vmatprep.subr.bf16.mxu0 %v1601_v2 }
 0x258   : > { %v985_v34 = vsel %vm984_vm8, %v983_v32, %v973_v21 }
 0x259   : > { %v987_v35 = vsel %vm986_vm9, %v985_v34, %v976_v23 }
 0x25a   : > { %v979_v37 = vpop.permute.xlu1 %978 }
 0x25b   : > { %v989_v39 = vsel %vm988_vm10, %v987_v35, %v979_v37 }
 0x25c   : > { %v1012_v40 = vmul.f32 %v1011_v38, %v989_v39 }
 0x25e   : > { %v1025_v41 = vpack.c.bf16 %v1012_v40, %v1012_v40 }
 0x260   : > { %1452 = vmatmul.mubr.msk.bf16.vlgmr.msra.gmra.mrb[12].mxu1 %vm1032_vm11, %v1025_v41 }
 0x333   : > { %v1070_v48 = vpop.f32.mrb[12].mxu1 }
 0x334   : > { %1077 = vrot.lane.b32.xlu1 %v1070_v48, %s1611_s19  ;;  %v1453_v49 = vpop.f32.mrb[13].mxu1  ;;  %s1350_s19 = sshll.u32 %s1720_s25, 7  ;;  %s1613_s25 = smov [#allocation2]  }
 0x335   : > { %v1073_v50 = vpop.f32.mrb[14].mxu1  ;;  %s2028_s29 = scalar_lea.hbm %s2086_s16, %s1350_s19  ;;  %s1541_s23 = sshll.u32 %s1613_s25, 4  ;;  %s1542_s23 = int_to_ptr.vmem [resolvable:$false] %s1541_s23 }
 0x336   : > { %v1454_v51 = vpop.f32.mrb[15].mxu1  ;;  %s1543_s2 = scalar_lea.vmem %s1542_s23, 256  ;;  %p1544_p0 = scmp.lt.s32.totalorder %s2030_s26, %s1542_s23 }
 0x337   : > { %p1545_p1 = scmp.lt.s32.totalorder %s1543_s2, %s1537_s28 }
 0x339   : > { %p1546_p2 = por %p1545_p1, %p1544_p0 }
 0x33b   : > { %p1547_p3 = pnand %p1546_p2, %p1540_p13 }
 0x3a6   : > { %v1078_v54 = vpop.permute.xlu1 %1077 }
 0x3a7   : > { %v1080_v55 = vsel %vm981_vm0, %v1951_v5, %v1078_v54  ;;  %v1346_v5 = vld [vmem:[%s2085_s15] ss:$0 sm:$0xff] }
 0x3a8   : > { %v1084_v57 = vpack.c.bf16 %v1080_v55, %v1080_v55 }
 0x3aa   : > { %1460 = vmatmul.mubr.msk.bf16.vlgmr.msra.gmra.mrb[8].mxu0 %vm1094_vm12, %v1084_v57 }
 0x3ab   : > { %1464 = vmatpush3.bf16.msra.mxu0 %v1147_v56  ;;  %1467 = vmatprep.mubr.msk.bf16.mxu0 %vm1603_vm2, %v1601_v2 }
 0x3ac   : > { %1465 = vmatprep.subr.bf16.mxu0 %v1601_v2 }
 0x3af   : > { %1466 = vmatpush3.bf16.msra.mxu0 %v1148_v60 }
 0x47d   : > { %v1135_v62 = vpop.f32.mrb[8].mxu0 }
 0x47e   : > { %v1136_v63 = vadd.f32 %v1344_v61, %v1135_v62  ;;  %v1461_v0 = vpop.f32.mrb[9].mxu0 }
 0x47f   : > { %v1138_v1 = vpop.f32.mrb[10].mxu0 }
 0x480   : > { %v1141_v2 = vmax.f32 %v1136_v63, 0.0  ;;  %v1462_v3 = vpop.f32.mrb[11].mxu0 }
 0x482   : > { %v1146_v4 = vpack.c.bf16 %v1141_v2, %v1141_v2 }
 0x484   : > { %1468 = vmatmul.mubr.msk.bf16.vlgmr.msra.gmra.mrb[12].mxu0 %vm647_vm6, %v1146_v4 }
 0x557   : > { %v1193_v6 = vpop.f32.mrb[12].mxu0 }
 0x558   : > { %v1194_v7 = vadd.f32 %v1346_v5, %v1193_v6  ;;  %v1469_v8 = vpop.f32.mrb[13].mxu0 }
 0x559   : > { %v1196_v9 = vpop.f32.mrb[14].mxu0 }
 0x55a   : > { %v1348_v10 = vmul.f32 -1.442695, %v1194_v7  ;;  %v1470_v11 = vpop.f32.mrb[15].mxu0 }
 0x55c   : > { %1533 = vpow2.f32 %v1348_v10 }
 0x566   : > { %v1534_v12 = vpop.eup %1533 }
 0x567   : > { %v1202_v13 = vadd.f32 1.0, %v1534_v12 }
 0x569   : > { %1535 = vrcp.f32 %v1202_v13 }
 0x573   : > { %v1536_v14 = vpop.eup %1535 }
 0x574   : > { %1205 = vst [vmem:[%s551_s30] sm:$0xff] %v1536_v14 }
 0x575   : > { %1550 = shalt.err (!%p1547_p3)
}
 0x576   : > { %s1551_s1 = scalar_lea.hbm %s2028_s29, 128  ;;  %s1555_s20 = scalar_lea.hbm %s2086_s16, 256 }
 0x577   : > { %p1552_p4 = scmp.ne.s32.totalorder %s2028_s29, %s1551_s1  ;;  %p1556_p9 = scmp.lt.u32.totalorder %s2028_s29, %s2086_s16 }
 0x578   : > { %p1557_p10 = scmp.lt.u32.totalorder %s1555_s20, %s1551_s1  ;;  %p1559_p12 = scmp.lt.u32.totalorder %s1551_s1, %s2028_s29 }
 0x579   : > { %p1553_p7 = pnand %p1552_p4, %p1737_p5 }
 0x57a   : > { %p1558_p11 = por %p1557_p10, %p1556_p9 }
 0x57b   : > { %p1554_p8 = pneg %p1553_p7 }
 0x57c   : > { %p1560_p13 = por %p1559_p12, %p1558_p11 }
 0x57e   : > { %p1561_p0 = pnand %p1560_p13, %p1554_p8 }
 0x580   : > { %1564 = shalt.err (!%p1561_p0)
}
 0x581   : > { %1471 = dma.vmem_to_hbm [thread:$0]  (%p1737_p5), %s2030_s26, 128, %s2028_s29, %s1207_s18  }
 0x582 PF: > { %p1477_p1 = scmp.ge.s32.totalorder %s1599_s24, 2  ;;  %s1232_s2 = sand.u32 1, %s1587_s21  }
 0x583   : > { %s1233_s28 = scalar_lea.sflag [#allocation3], %s1232_s2 }
 0x584   : > { %p1474_p2 = pnand %p1477_p1, %p1741_p6 }
 0x586   : > { %1582 = dma.done.wait (!%p1474_p2), %s1233_s28, 128  }
 0x587   : > { %1584 = vsyncadd (!%p1474_p2), %s1233_s28, 4294967168  ;;  %s2105_s24 = sld [smem:[#allocation6_spill]]  ;;  %s2106_s23 = sld [smem:[#allocation5_spill]] }
 0x588   : > { %s2107_s1 = sld [smem:[#allocation7_spill]]  ;;  %s2108_s21 = smov %s1591_s22 }
 0x58d   : > { %p26_p3 = scmp.ge.s32.totalorder %s2105_s24, 4   ;;  %s2109_s22 = smov %s2106_s23 }
 0x58e   : > { %s2110_s23 = smov %s2107_s1 }
 0x58f   :  { %28 = sbr.rel (!%p26_p3) target bundleno = 7 (0x7), region = 128 }
 0x596   :  { %1238 = vsyncpa [#allocation3], 1 }
 0x597   :  { %1240 = vsyncpa [#allocation3 + $0x1], 1 }

// kernel: tpu_custom_call.1
= control target key start
LH: loop header
LB: loop body
LE: loop exit
PB: predicated region body
PF: predicated region fallthrough
CT: control target
= control target key end

     0   :  { %s2070_s0 = inlined_call_operand.vmem [shape: f32[16,13], index: 0, kind: input, shape index: {}]   ;;  %s2071_s1 = inlined_call_operand.vmem [shape: f32[13,32], index: 1, kind: input, shape index: {}]   ;;  %s2072_s2 = inlined_call_operand.vmem [shape: f32[1,32], index: 2, kind: input, shape index: {}]   ;;  %s2073_s3 = inlined_call_operand.vmem [shape: f32[32,16], index: 3, kind: input, shape index: {}]   ;;  %s2074_s4 = inlined_call_operand.vmem [shape: f32[1,16], index: 4, kind: input, shape index: {}]   ;;  %s2075_s5 = inlined_call_operand.vmem [shape: s32[16,4], index: 5, kind: input, shape index: {}]   ;;  %s2076_s6 = inlined_call_operand.vmem [shape: f32[50,16], index: 6, kind: input, shape index: {}]   ;;  %s2077_s7 = inlined_call_operand.vmem [shape: s32[16,4], index: 7, kind: input, shape index: {}]   ;;  %s2078_s8 = inlined_call_operand.vmem [shape: f32[60,16], index: 8, kind: input, shape index: {}]   ;;  %s2079_s9 = inlined_call_operand.vmem [shape: s32[16,4], index: 9, kind: input, shape index: {}]   ;;  %s2080_s10 = inlined_call_operand.vmem [shape: f32[70,16], index: 10, kind: input, shape index: {}]   ;;  %s2081_s11 = inlined_call_operand.vmem [shape: f32[96,6], index: 11, kind: input, shape index: {}]   ;;  %s2082_s12 = inlined_call_operand.vmem [shape: f32[22,32], index: 12, kind: input, shape index: {}]   ;;  %s2083_s13 = inlined_call_operand.vmem [shape: f32[1,32], index: 13, kind: input, shape index: {}]   ;;  %s2084_s14 = inlined_call_operand.vmem [shape: f32[32,128], index: 14, kind: input, shape index: {}]   ;;  %s2085_s15 = inlined_call_operand.vmem [shape: f32[1,128], index: 15, kind: input, shape index: {}]   ;;  %s2086_s16 = inlined_call_operand.hbm [shape: f32[16,128], index: 16, kind: output, shape index: {}]  }
   0x1   :  { %2092 = sst [smem:[#allocation8_spill]] %s2070_s0 }
   0x2   :  { %2093 = sst [smem:[#allocation9_spill]] %s2071_s1 }
   0x3   :  { %2094 = sst [smem:[#allocation10_spill]] %s2072_s2 }
   0x4   :  { %21 = vsyncpa [#allocation3], 0 }
   0x5   :  { %23 = vsyncpa [#allocation3 + $0x1], 0  ;;  %s1699_s21 = smov 0   ;;  %s1701_s22 = smov 0  }
   0x6   :  { %s1703_s23 = smov 0   ;;  %s1705_s24 = smov 0  }
   0x7 LB: > { %2095 = sst [smem:[#allocation5_spill]] %s1595_s23  ;;  %s1720_s25 = sadd.s32 4294967295, %s1599_s24   ;;  %s1599_s24 = sphi %s1705_s24, %s2105_s24   ;;  %s1595_s23 = sphi %s1703_s23, %s2110_s23   ;;  %s1591_s22 = sphi %s1701_s22, %s2109_s22   ;;  %s1587_s21 = sphi %s1699_s21, %s2108_s21  }
   0x8   : > { %s1315_s26 = sadd.s32 4294967294, %s1599_s24   ;;  %s1724_s27 = sadd.s32 1, %s1599_s24  }
   0x9   : > { %2096 = sst [smem:[#allocation6_spill]] %s1724_s27  ;;  %s392_s28 = sadd.s32 1, %s1595_s23 }
   0xa   : > { %s389_s29 = ssub.s32 %s1599_s24, %s1724_s27  ;;  %p402_p0 = scmp.ne.s32.totalorder %s1595_s23, %s1591_s22 }
   0xb   : > { %p390_p1 = scmp.eq.s32.totalorder %s389_s29, 0  ;;  %p403_p2 = scmp.eq.s32.totalorder %s1720_s25, 1 }
   0xc   : > { %p408_p3 = scmp.ne.s32.totalorder %s1591_s22, %s1587_s21  ;;  %p409_p4 = scmp.eq.s32.totalorder %s1315_s26, 1 }
   0xd   : > { %s1735_s30 = scalar_select %p390_p1, %s1595_s23, %s392_s28  }
   0xe   : > { %p1737_p5 = por %p403_p2, %p402_p0  ;;  %p1741_p6 = por %p409_p4, %p408_p3 }
   0xf   : > { %2097 = sst [smem:[#allocation7_spill]] %s1735_s30  ;;  %p1318_p7 = scmp.ge.s32.totalorder %s1599_s24, 1 }
  0x10   : > { %p491_p8 = scmp.lt.s32.totalorder %s1599_s24, 3 }
  0x12   : > { %p492_p9 = pnand %p1318_p7, %p491_p8 }
  0x13   : > { %s2100_s1 = sld [smem:[#allocation9_spill]] (!%p492_p9)  ;;  %vm585_vm0 = vcmask (!%p492_p9), 1045504   ;;  %vm586_vm1 = vcmask (!%p492_p9), 1046528   ;;  %v1601_v2 = vmov (!%p492_p9), 0.0   ;;  %p552_p10 = scmp.lt.s32.totalorder (!%p492_p9), %s1720_s25, 1  ;;  %v723_v4 = vld [vmem:[%s2076_s6] sm:$0xff] (!%p492_p9)  ;;  %v693_v35 = vlaneseq (!%p492_p9) }
  0x14   : > { %495 = sbr.rel (%p492_p9) target bundleno = 1410 (0x582), region = 84  ;;  %1387 = vmatprep.subr.bf16.mxu1 (!%p492_p9), %v1601_v2  ;;  %1401 = vmatprep.subr.bf16.mxu0 (!%p492_p9), %v1601_v2  ;;  %v724_v5 = vld [vmem:[%s2076_s6 + $0x8] sm:$0xff] (!%p492_p9)  ;;  %v1602_v6 = vmov (!%p492_p9), 65535   ;;  %vm1603_vm2 = vmmov (!%p492_p9), 0   ;;  %v1604_v9 = vmov (!%p492_p9), 2   ;;  %v1605_v10 = vmov (!%p492_p9), 0  }
  0x15   : > { %v587_v7 = vsel (!%p492_p9), %vm585_vm0, 4294967295, %v1602_v6  ;;  %1389 = vmatprep.mubr.msk.bf16.mxu1 (!%p492_p9), %vm1603_vm2, %v1601_v2  ;;  %1409 = vmatprep.mubr.msk.bf16.mxu0 (!%p492_p9), %vm1603_vm2, %v1601_v2  ;;  %v731_v11 = vpack.c.bf16 (!%p492_p9), %v724_v5, %v723_v4  ;;  %s2101_s18 = sld [smem:[#allocation8_spill]] (!%p492_p9)  ;;  %vm581_vm3 = vcmask (!%p492_p9), 105472   ;;  %v725_v16 = vld [vmem:[%s2076_s6 + $0x10] sm:$0xff] (!%p492_p9)  ;;  %v726_v17 = vld [vmem:[%s2076_s6 + $0x18] sm:$0xff] (!%p492_p9)  ;;  %v1606_v19 = vmov (!%p492_p9), 3  }
  0x16   : > { %v588_v8 = vsel (!%p492_p9), %vm586_vm1, %v587_v7, 0  ;;  %1524 = vset.pattern.permute.xlu1 (!%p492_p9), %v1604_v9  ;;  %1522 = vset.pattern.permute.xlu0 (!%p492_p9), %v1605_v10  ;;  %v732_v18 = vpack.c.bf16 (!%p492_p9), %v726_v17, %v725_v16  ;;  %v1607_v20 = vmov (!%p492_p9), 1   ;;  %v727_v23 = vld [vmem:[%s2076_s6 + $0x20] sm:$0xff] (!%p492_p9)  ;;  %v728_v24 = vld [vmem:[%s2076_s6 + $0x28] sm:$0xff] (!%p492_p9)  ;;  %v729_v25 = vld [vmem:[%s2076_s6 + $0x30] sm:$0x3] (!%p492_p9) }
  0x17   : > { %1402 = vmatpush3.bf16.msra.mxu0 (!%p492_p9), %v731_v11  ;;  %v733_v26 = vpack.c.bf16 (!%p492_p9), %v728_v24, %v727_v23  ;;  %v734_v27 = vpack.c.bf16 (!%p492_p9), %v729_v25, %v729_v25  ;;  %vm739_vm4 = vcmask (!%p492_p9), 1040384   ;;  %v633_v29 = vld [vmem:[%s2073_s3] sm:$0xff] (!%p492_p9)  ;;  %v634_v30 = vld [vmem:[%s2073_s3 + $0x8] sm:$0xff] (!%p492_p9)  ;;  %v635_v32 = vld [vmem:[%s2073_s3 + $0x10] sm:$0xff] (!%p492_p9)  ;;  %v1822_v36 = vand.u32 (!%p492_p9), 127, %v693_v35  ;;  %s2102_s2 = sld [smem:[#allocation10_spill]] (!%p492_p9) }
  0x18   : > { %1403 = vmatprep.subr.bf16.mxu0 (!%p492_p9), %v1601_v2  ;;  %v638_v31 = vpack.c.bf16 (!%p492_p9), %v634_v30, %v633_v29  ;;  %v636_v33 = vld [vmem:[%s2073_s3 + $0x18] sm:$0xff] (!%p492_p9)  ;;  %v901_v49 = vld [vmem:[%s2080_s10] sm:$0xff] (!%p492_p9)  ;;  %v902_v50 = vld [vmem:[%s2080_s10 + $0x8] sm:$0xff] (!%p492_p9)  ;;  %vm735_vm11 = vcmask (!%p492_p9), 408576   ;;  %s1609_s28 = smov (!%p492_p9), 64   ;;  %s2091_s29 = smov (!%p492_p9), 48  }
  0x19   : > { %v570_v0 = vld [vmem:[%s2100_s1] sm:$0xff] (!%p492_p9)  ;;  %v571_v1 = vld [vmem:[%s2100_s1 + $0x8] sm:$0x1f] (!%p492_p9)  ;;  %v741_v28 = vsel (!%p492_p9), %vm739_vm4, %v734_v27, 0  ;;  %v639_v34 = vpack.c.bf16 (!%p492_p9), %v636_v33, %v635_v32  ;;  %v911_v55 = vpack.c.bf16 (!%p492_p9), %v902_v50, %v901_v49  ;;  %v903_v57 = vld [vmem:[%s2080_s10 + $0x10] sm:$0xff] (!%p492_p9)  ;;  %s2104_s1 = smov (!%p492_p9), 32  }
  0x1a   : > { %v573_v3 = vpack.c.bf16 (!%p492_p9), %v571_v1, %v570_v0  ;;  %v904_v58 = vld [vmem:[%s2080_s10 + $0x18] sm:$0xff] (!%p492_p9)  ;;  %v905_v0 = vld [vmem:[%s2080_s10 + $0x20] sm:$0xff] (!%p492_p9)  ;;  %v906_v1 = vld [vmem:[%s2080_s10 + $0x28] sm:$0xff] (!%p492_p9) }
  0x1b   : > { %s553_s20 = scalar_select %p552_p10, %s1720_s25, 1  ;;  %1404 = vmatpush3.bf16.msra.mxu0 %v732_v18  ;;  %v912_v62 = vpack.c.bf16 %v904_v58, %v903_v57  ;;  %v913_v6 = vpack.c.bf16 %v906_v1, %v905_v0  ;;  %v813_v29 = vld [vmem:[%s2078_s8 + $0x8] sm:$0xff]  ;;  %v814_v35 = vld [vmem:[%s2078_s8 + $0x10] sm:$0xff]  ;;  %v1016_v58 = vld [vmem:[%s2081_s11 + $0x18] sm:$0xff] }
  0x1c   : > { %v590_v12 = vand.u32 %v588_v8, %v573_v3  ;;  %1405 = vmatprep.subr.bf16.mxu0 %v1601_v2  ;;  %v907_v8 = vld [vmem:[%s2080_s10 + $0x30] sm:$0xff] }
  0x1d   : > { %s1768_s26 = sshll.u32 %s553_s20, 3  ;;  %v1324_v24 = vld [vmem:[%s2102_s2] ss:$0 sm:$0xff]  ;;  %s2090_s20 = smov 32   ;;  %v1015_v57 = vld [vmem:[%s2081_s11 + $0x10] sm:$0xff] }
  0x1e   : > { %1388 = vmatpush3.bf16.msra.mxu1 %v590_v12  ;;  %s555_s19 = scalar_lea.vmem %s2101_s18, %s1768_s26  ;;  %s559_s23 = scalar_lea.vmem %s2075_s5, %s1768_s26 }
  0x1f   : > { %v569_v13 = vld [vmem:[%s555_s19] sm:$0xff]  ;;  %1393 = vmatprep.subr.bf16.mxu1 %v1601_v2  ;;  %s563_s30 = scalar_lea.vmem %s2077_s7, %s1768_s26  ;;  %s567_s19 = scalar_lea.vmem %s2079_s9, %s1768_s26  ;;  %1406 = vmatpush3.bf16.msra.mxu0 %v733_v26 }
  0x20   : > { %v692_v14 = vld [vmem:[%s559_s23] sm:$0xff]  ;;  %v572_v15 = vpack.c.bf16 %v569_v13, %v569_v13  ;;  %1407 = vmatprep.subr.bf16.mxu0 %v1601_v2  ;;  %s2103_s26 = smov 48  }
  0x21   : > { %710 = vperm.xlu1 %1524, %v692_v14   ;;  %696 = vperm.xlu0 %1522, %v692_v14   ;;  %v783_v21 = vld [vmem:[%s563_s30] sm:$0xff] }
  0x22   : > { %1390 = vmatmul.mubr.msk.bf16.vlgmr.msra.gmra.mrb[0].mxu1 %vm581_vm3, %v572_v15  ;;  %v872_v22 = vld [vmem:[%s567_s19] sm:$0xff]  ;;  %vm920_vm3 = vcmask 1042432   ;;  %s1611_s19 = smov 16  }
  0x23   : > { %1397 = vmatprep.mubr.msk.bf16.mxu1 %vm1603_vm2, %v1601_v2  ;;  %1408 = vmatpush3.bf16.msra.mxu0 %v741_v28  ;;  %v812_v28 = vld [vmem:[%s2078_s8] sm:$0xff] }
  0x24   : > { %1425 = vmatprep.subr.bf16.mxu0 %v1601_v2  ;;  %1394 = vmatpush3.bf16.msra.mxu1 %v638_v31  ;;  %v821_v33 = vpack.c.bf16 %v813_v29, %v812_v28 }
  0x25   : > { %1525 = vset.pattern.permute.xlu1 %v1606_v19  ;;  %1523 = vset.pattern.permute.xlu0 %v1607_v20 }
  0x26   : > { %717 = vperm.xlu1 %1525, %v692_v14   ;;  %703 = vperm.xlu0 %1523, %v692_v14  }
  0x27   : > { %1395 = vmatprep.subr.bf16.mxu1 %v1601_v2 }
  0x28   : > { %1396 = vmatpush3.bf16.msra.mxu1 %v639_v34 }
  0x29   : > { %1413 = vmatprep.subr.bf16.mxu1 %v1601_v2 }
  0x2a   : > { %1526 = vset.pattern.permute.xlu1 %v1605_v10  ;;  %792 = vperm.xlu0 %1523, %v783_v21  }
  0x2b   : > { %785 = vperm.xlu1 %1526, %v783_v21  }
  0x2e   : > { %1528 = vset.pattern.permute.xlu0 %v1605_v10  ;;  %v909_v10 = vld [vmem:[%s2080_s10 + $0x40] sm:$0x3f] }
  0x2f   : > { %1527 = vset.pattern.permute.xlu1 %v1604_v9  ;;  %874 = vperm.xlu0 %1528, %v872_v22   ;;  %v915_v15 = vpack.c.bf16 %v909_v10, %v909_v10  ;;  %v1021_v10 = vld [vmem:[%s2081_s11 + $0x40] sm:$0xff] }
  0x30   : > { %799 = vperm.xlu1 %1527, %v783_v21  }
  0x33   : > { %1531 = vset.pattern.permute.xlu0 %v1604_v9  ;;  %v908_v9 = vld [vmem:[%s2080_s10 + $0x38] sm:$0xff] }
  0x34   : > { %1529 = vset.pattern.permute.xlu1 %v1607_v20  ;;  %888 = vperm.xlu0 %1531, %v872_v22   ;;  %v914_v14 = vpack.c.bf16 %v908_v9, %v907_v8  ;;  %v922_v20 = vsel %vm920_vm3, %v915_v15, 0  ;;  %v1020_v8 = vld [vmem:[%s2081_s11 + $0x38] sm:$0xff] }
  0x35   : > { %881 = vperm.xlu1 %1529, %v872_v22  }
  0x38   : > { %1532 = vset.pattern.permute.xlu0 %v1606_v19 }
  0x39   : > { %1530 = vset.pattern.permute.xlu1 %v1606_v19 }
  0x3a   : > { %806 = vperm.xlu1 %1530, %v783_v21  }
  0x3e   : > { %895 = vperm.xlu1 %1530, %v872_v22  }
  0xa0   : > { %v711_v37 = vpop.permute.xlu1 %710  ;;  %v697_v38 = vpop.permute.xlu0 %696 }
  0xa1   : > { %vm698_vm5 = vcmp.eq.s32.totalorder %v1822_v36, %v697_v38  ;;  %vm712_vm6 = vcmp.eq.s32.totalorder %v1822_v36, %v711_v37  ;;  %v816_v38 = vld [vmem:[%s2078_s8 + $0x20] sm:$0xff] }
  0xa2   : > { %v1328_v39 = vsel %vm698_vm5, 1.0, %v1601_v2  ;;  %v1330_v42 = vsel %vm712_vm6, 1.0, %v1601_v2  ;;  %vm916_vm5 = vcmask 572416   ;;  %vm647_vm6 = vcmask 261120  }
  0xa5   : > { %v718_v40 = vpop.permute.xlu1 %717  ;;  %v704_v41 = vpop.permute.xlu0 %703 }
  0xa6   : > { %vm719_vm7 = vcmp.eq.s32.totalorder %v1822_v36, %v718_v40  ;;  %vm705_vm8 = vcmp.eq.s32.totalorder %v1822_v36, %v704_v41  ;;  %v818_v40 = vld [vmem:[%s2078_s8 + $0x30] sm:$0xff]  ;;  %v819_v41 = vld [vmem:[%s2078_s8 + $0x38] sm:$0xf] }
  0xa7   : > { %v1329_v43 = vsel %vm705_vm8, 1.0, %v1601_v2  ;;  %v1331_v45 = vsel %vm719_vm7, 1.0, %v1601_v2  ;;  %vm825_vm7 = vcmask 490496   ;;  %vm984_vm8 = vcmask 392192  }
  0xa8   : > { %v708_v44 = vadd.f32 %v1329_v43, %v1328_v39  ;;  %v817_v39 = vld [vmem:[%s2078_s8 + $0x28] sm:$0xff]  ;;  %v824_v43 = vpack.c.bf16 %v819_v41, %v818_v40 }
  0xa9   : > { %v793_v46 = vpop.permute.xlu0 %792 }
  0xaa   : > { %v715_v47 = vadd.f32 %v1330_v42, %v708_v44  ;;  %v786_v48 = vpop.permute.xlu1 %785  ;;  %vm794_vm9 = vcmp.eq.s32.totalorder %v1822_v36, %v793_v46  ;;  %v823_v42 = vpack.c.bf16 %v817_v39, %v816_v38  ;;  %v830_v44 = vsel %vm585_vm0, %v824_v43, 0  ;;  %v1082_v43 = vld [vmem:[%s2082_s12 + $0x8] sm:$0xff] }
  0xab   : > { %vm787_vm10 = vcmp.eq.s32.totalorder %v1822_v36, %v786_v48  ;;  %v1334_v51 = vsel %vm794_vm9, 1.0, %v1601_v2  ;;  %vm981_vm0 = vcmask 130048   ;;  %vm986_vm9 = vcmask 523264  }
  0xac   : > { %v722_v52 = vadd.f32 %v1331_v45, %v715_v47  ;;  %v1333_v53 = vsel %vm787_vm10, 1.0, %v1601_v2  ;;  %vm988_vm10 = vcmask 654336  }
  0xad   : > { %v797_v54 = vadd.f32 %v1334_v51, %v1333_v53 }
  0xae   : > { %v730_v56 = vpack.c.bf16 %v722_v52, %v722_v52  ;;  %v875_v59 = vpop.permute.xlu0 %874 }
  0xaf   : > { %v800_v60 = vpop.permute.xlu1 %799  ;;  %vm876_vm13 = vcmp.eq.s32.totalorder %v1822_v36, %v875_v59  ;;  %v1027_v59 = vpack.c.bf16 %v1016_v58, %v1015_v57  ;;  %v1144_v58 = vld [vmem:[%s2084_s14 + $0x10] sm:$0xff] }
  0xb0   : > { %vm801_vm12 = vcmp.eq.s32.totalorder %v1822_v36, %v800_v60  ;;  %1410 = vmatmul.mubr.msk.bf16.vlgmr.msra.gmra.mrb[0].mxu0 %vm735_vm11, %v730_v56  ;;  %v1338_v5 = vsel %vm876_vm13, 1.0, %v1601_v2  ;;  %v1017_v60 = vld [vmem:[%s2081_s11 + $0x20] sm:$0xff]  ;;  %vm1032_vm11 = vcmask 785408  }
  0xb1   : > { %v1335_v61 = vsel %vm801_vm12, 1.0, %v1601_v2  ;;  %1426 = vmatpush3.bf16.msra.mxu0 %v911_v55  ;;  %1435 = vmatprep.mubr.msk.bf16.mxu0 %vm1603_vm2, %v1601_v2  ;;  %v1014_v55 = vld [vmem:[%s2081_s11 + $0x8] sm:$0xff]  ;;  %vm1094_vm12 = vcmask 179200  }
  0xb2   : > { %v804_v63 = vadd.f32 %v1335_v61, %v797_v54  ;;  %1427 = vmatprep.subr.bf16.mxu0 %v1601_v2  ;;  %v1013_v54 = vld [vmem:[%s2081_s11] sm:$0xff]  ;;  %v1018_v61 = vld [vmem:[%s2081_s11 + $0x28] sm:$0xff] }
  0xb3   : > { %v889_v3 = vpop.permute.xlu0 %888  ;;  %v1026_v56 = vpack.c.bf16 %v1014_v55, %v1013_v54 }
  0xb4   : > { %v882_v4 = vpop.permute.xlu1 %881  ;;  %vm890_vm15 = vcmp.eq.s32.totalorder %v1822_v36, %v889_v3 }
  0xb5   : > { %vm883_vm14 = vcmp.eq.s32.totalorder %v1822_v36, %v882_v4  ;;  %1428 = vmatpush3.bf16.msra.mxu0 %v912_v62  ;;  %v1340_v13 = vsel %vm890_vm15, 1.0, %v1601_v2  ;;  %v1326_v62 = vld [vmem:[%s2074_s4] ss:$0 sm:$0xff] }
  0xb6   : > { %v1339_v7 = vsel %vm883_vm14, 1.0, %v1601_v2  ;;  %1429 = vmatprep.subr.bf16.mxu0 %v1601_v2 }
  0xb7   : > { %v886_v11 = vadd.f32 %v1339_v7, %v1338_v5  ;;  %v1019_v7 = vld [vmem:[%s2081_s11 + $0x30] sm:$0xff] }
  0xb8   : > { %v1029_v9 = vpack.c.bf16 %v1020_v8, %v1019_v7 }
  0xb9   : > { %v807_v12 = vpop.permute.xlu1 %806  ;;  %1430 = vmatpush3.bf16.msra.mxu0 %v913_v6  ;;  %v893_v18 = vadd.f32 %v1340_v13, %v886_v11  ;;  %v1022_v11 = vld [vmem:[%s2081_s11 + $0x48] sm:$0xff]  ;;  %v1023_v13 = vld [vmem:[%s2081_s11 + $0x50] sm:$0xff] }
  0xba   : > { %vm808_vm1 = vcmp.eq.s32.totalorder %v1822_v36, %v807_v12  ;;  %1431 = vmatprep.subr.bf16.mxu0 %v1601_v2  ;;  %v1030_v12 = vpack.c.bf16 %v1022_v11, %v1021_v10 }
  0xbb   : > { %v1336_v16 = vsel %vm808_vm1, 1.0, %v1601_v2 }
  0xbc   : > { %v811_v17 = vadd.f32 %v1336_v16, %v804_v63  ;;  %v1028_v63 = vpack.c.bf16 %v1018_v61, %v1017_v60  ;;  %v1344_v61 = vld [vmem:[%s2083_s13] ss:$0 sm:$0xff] }
  0xbd   : > { %v896_v19 = vpop.permute.xlu1 %895  ;;  %1432 = vmatpush3.bf16.msra.mxu0 %v914_v14  ;;  %v1024_v14 = vld [vmem:[%s2081_s11 + $0x58] sm:$0xff] }
  0xbe   : > { %vm897_vm4 = vcmp.eq.s32.totalorder %v1822_v36, %v896_v19  ;;  %1433 = vmatprep.subr.bf16.mxu0 %v1601_v2  ;;  %v815_v36 = vld [vmem:[%s2078_s8 + $0x18] sm:$0xff]  ;;  %v820_v45 = vpack.c.bf16 %v811_v17, %v811_v17  ;;  %v1031_v15 = vpack.c.bf16 %v1024_v14, %v1023_v13 }
  0xbf   : > { %v1341_v21 = vsel %vm897_vm4, 1.0, %v1601_v2  ;;  %v822_v37 = vpack.c.bf16 %v815_v36, %v814_v35 }
  0xc0   : > { %v900_v22 = vadd.f32 %v1341_v21, %v893_v18 }
  0xc1   : > { %1434 = vmatpush3.bf16.msra.mxu0 %v922_v20 }
  0xc2   : > { %v910_v23 = vpack.c.bf16 %v900_v22, %v900_v22  ;;  %1455 = vmatprep.subr.bf16.mxu0 %v1601_v2 }
  0xc4   : > { %1436 = vmatmul.mubr.msk.bf16.vlgmr.msra.gmra.mrb[4].mxu0 %vm916_vm5, %v910_v23 }
  0xc5   : > { %1459 = vmatprep.mubr.msk.bf16.mxu0 %vm1603_vm2, %v1601_v2 }
  0xf5   : > { %v626_v25 = vpop.f32.mrb[0].mxu1 }
  0xf6   : > { %v627_v26 = vadd.f32 %v1324_v24, %v626_v25  ;;  %v1391_v27 = vpop.f32.mrb[1].mxu1 }
  0xf7   : > { %v629_v30 = vpop.f32.mrb[2].mxu1 }
  0xf8   : > { %v632_v31 = vmax.f32 %v627_v26, 0.0  ;;  %v1392_v32 = vpop.f32.mrb[3].mxu1 }
  0xfa   : > { %v637_v34 = vpack.c.bf16 %v632_v31, %v632_v31 }
  0xfc   : > { %1398 = vmatmul.mubr.msk.bf16.vlgmr.msra.gmra.mrb[4].mxu1 %vm647_vm6, %v637_v34 }
  0xfd   : > { %1414 = vmatpush3.bf16.msra.mxu1 %v821_v33  ;;  %1421 = vmatprep.mubr.msk.bf16.mxu1 %vm1603_vm2, %v1601_v2 }
  0xfe   : > { %1415 = vmatprep.subr.bf16.mxu1 %v1601_v2 }
 0x101   : > { %1416 = vmatpush3.bf16.msra.mxu1 %v822_v37 }
 0x102   : > { %1417 = vmatprep.subr.bf16.mxu1 %v1601_v2 }
 0x105   : > { %1418 = vmatpush3.bf16.msra.mxu1 %v823_v42  ;;  %v1081_v42 = vld [vmem:[%s2082_s12] sm:$0xff] }
 0x106   : > { %1419 = vmatprep.subr.bf16.mxu1 %v1601_v2 }
 0x109   : > { %1420 = vmatpush3.bf16.msra.mxu1 %v830_v44  ;;  %v1083_v44 = vld [vmem:[%s2082_s12 + $0x10] sm:$0x3f] }
 0x10a   : > { %1439 = vmatprep.subr.bf16.mxu1 %v1601_v2 }
 0x10c   : > { %1422 = vmatmul.mubr.msk.bf16.vlgmr.msra.gmra.mrb[8].mxu1 %vm825_vm7, %v820_v45  ;;  %v1085_v45 = vpack.c.bf16 %v1082_v43, %v1081_v42 }
 0x10d   : > { %1451 = vmatprep.mubr.msk.bf16.mxu1 %vm1603_vm2, %v1601_v2  ;;  %1440 = vmatpush3.bf16.msra.mxu1 %v1026_v56 }
 0x10e   : > { %1441 = vmatprep.subr.bf16.mxu1 %v1601_v2  ;;  %1456 = vmatpush3.bf16.msra.mxu0 %v1085_v45 }
 0x10f   : > { %1457 = vmatprep.subr.bf16.mxu0 %v1601_v2 }
 0x111   : > { %1442 = vmatpush3.bf16.msra.mxu1 %v1027_v59  ;;  %v1145_v59 = vld [vmem:[%s2084_s14 + $0x18] sm:$0xff] }
 0x112   : > { %1443 = vmatprep.subr.bf16.mxu1 %v1601_v2  ;;  %v1148_v60 = vpack.c.bf16 %v1145_v59, %v1144_v58 }
 0x115   : > { %1444 = vmatpush3.bf16.msra.mxu1 %v1028_v63 }
 0x116   : > { %1445 = vmatprep.subr.bf16.mxu1 %v1601_v2 }
 0x119   : > { %1446 = vmatpush3.bf16.msra.mxu1 %v1029_v9 }
 0x11a   : > { %1447 = vmatprep.subr.bf16.mxu1 %v1601_v2 }
 0x11d   : > { %1448 = vmatpush3.bf16.msra.mxu1 %v1030_v12 }
 0x11e   : > { %1449 = vmatprep.subr.bf16.mxu1 %v1601_v2 }
 0x121   : > { %1450 = vmatpush3.bf16.msra.mxu1 %v1031_v15 }
 0x183   : > { %v1922_v46 = vpop.f32.mrb[0].mxu0 }
 0x184   : > { %995 = vrot.lane.b32.xlu0 %v1922_v46, %s2090_s20  ;;  %v1411_v47 = vpop.f32.mrb[1].mxu0 }
 0x185   : > { %v780_v48 = vpop.f32.mrb[2].mxu0 }
 0x186   : > { %v1412_v49 = vpop.f32.mrb[3].mxu0 }
 0x188   : > { %1001 = vrot.lane.b32.xlu0 %v1922_v46, %s1609_s28 }
 0x197   : > { %v958_v50 = vpop.f32.mrb[4].mxu0 }
 0x198   : > { %972 = vrot.lane.b32.xlu1 %v958_v50, %s2091_s29  ;;  %v1437_v51 = vpop.f32.mrb[5].mxu0 }
 0x199   : > { %v961_v52 = vpop.f32.mrb[6].mxu0 }
 0x19a   : > { %v1438_v53 = vpop.f32.mrb[7].mxu0  ;;  %v1142_v52 = vld [vmem:[%s2084_s14] sm:$0xff] }
 0x19b   : > { %v1143_v53 = vld [vmem:[%s2084_s14 + $0x8] sm:$0xff] }
 0x19c   : > { %975 = vrot.lane.b32.xlu1 %v958_v50, %s1609_s28  ;;  %s1612_s28 = smov 80   ;;  %v1147_v56 = vpack.c.bf16 %v1143_v53, %v1142_v52 }
 0x1cf   : > { %v685_v0 = vpop.f32.mrb[4].mxu1 }
 0x1d0   : > { %v686_v1 = vadd.f32 %v1326_v62, %v685_v0  ;;  %v1399_v3 = vpop.f32.mrb[5].mxu1 }
 0x1d1   : > { %v688_v4 = vpop.f32.mrb[6].mxu1 }
 0x1d2   : > { %v1951_v5 = vmax.f32 %v686_v1, 0.0  ;;  %v1400_v6 = vpop.f32.mrb[7].mxu1 }
 0x1d4   : > { %991 = vrot.lane.b32.xlu0 %v1951_v5, %s1611_s19 }
 0x1d8   : > { %998 = vrot.lane.b32.xlu0 %v1951_v5, %s2103_s26 }
 0x1df   : > { %v866_v16 = vpop.f32.mrb[8].mxu1 }
 0x1e0   : > { %1004 = vrot.lane.b32.xlu0 %v866_v16, %s1612_s28  ;;  %965 = vrot.lane.b32.xlu1 %v866_v16, %s1611_s19  ;;  %v1423_v17 = vpop.f32.mrb[9].mxu1 }
 0x1e1   : > { %v869_v18 = vpop.f32.mrb[10].mxu1 }
 0x1e2   : > { %v1424_v19 = vpop.f32.mrb[11].mxu1 }
 0x1e4   : > { %968 = vrot.lane.b32.xlu1 %v866_v16, %s2104_s1  ;;  %s549_s1 = sand.u32 1, %s1591_s22  }
 0x1e5   : > { %s1319_s23 = sshll.u32 %s549_s1, 3  ;;  %s1207_s18 = scalar_lea.sflag [#allocation3], %s549_s1 }
 0x1e6   : > { %s551_s30 = scalar_lea.vmem [#allocation2], %s1319_s23 }
 0x1e7   : > { %s1220_s26 = sshll.u32 %s551_s30, 4  ;;  %s2030_s26 = int_to_ptr.vmem [resolvable:$true] %s1220_s26 }
 0x1e8   : > { %978 = vrot.lane.b32.xlu1 %v958_v50, %s1612_s28  ;;  %s1537_s28 = scalar_lea.vmem %s2030_s26, 128 }
 0x1e9   : > { %p1538_p11 = scmp.ne.s32.totalorder %s2030_s26, %s1537_s28 }
 0x1eb   : > { %p1539_p12 = pnand %p1538_p11, %p1737_p5 }
 0x1ed   : > { %p1540_p13 = pneg %p1539_p12 }
 0x1f6   : > { %v996_v20 = vpop.permute.xlu0 %995 }
 0x1fa   : > { %v1002_v22 = vpop.permute.xlu0 %1001 }
 0x20a   : > { %v973_v21 = vpop.permute.xlu1 %972 }
 0x20e   : > { %v976_v23 = vpop.permute.xlu1 %975 }
 0x246   : > { %v992_v24 = vpop.permute.xlu0 %991 }
 0x247   : > { %v1007_v26 = vsel %vm981_vm0, %v1951_v5, %v992_v24 }
 0x248   : > { %v1008_v28 = vsel %vm647_vm6, %v1007_v26, %v996_v20 }
 0x24a   : > { %v999_v27 = vpop.permute.xlu0 %998 }
 0x24b   : > { %v1009_v31 = vsel %vm984_vm8, %v1008_v28, %v999_v27 }
 0x24c   : > { %v1010_v36 = vsel %vm986_vm9, %v1009_v31, %v1002_v22 }
 0x252   : > { %v966_v25 = vpop.permute.xlu1 %965  ;;  %v1005_v33 = vpop.permute.xlu0 %1004 }
 0x253   : > { %v982_v29 = vsel %vm981_vm0, %v1922_v46, %v966_v25  ;;  %v1011_v38 = vsel %vm988_vm10, %v1010_v36, %v1005_v33  ;;  %v1086_v46 = vpack.c.bf16 %v1083_v44, %v1083_v44 }
 0x255   : > { %v1099_v47 = vsel %vm920_vm3, %v1086_v46, 0 }
 0x256   : > { %v969_v30 = vpop.permute.xlu1 %968  ;;  %1458 = vmatpush3.bf16.msra.mxu0 %v1099_v47 }
 0x257   : > { %v983_v32 = vsel %vm647_vm6, %v982_v29, %v969_v30  ;;  %1463 = vmatprep.subr.bf16.mxu0 %v1601_v2 }
 0x258   : > { %v985_v34 = vsel %vm984_vm8, %v983_v32, %v973_v21 }
 0x259   : > { %v987_v35 = vsel %vm986_vm9, %v985_v34, %v976_v23 }
 0x25a   : > { %v979_v37 = vpop.permute.xlu1 %978 }
 0x25b   : > { %v989_v39 = vsel %vm988_vm10, %v987_v35, %v979_v37 }
 0x25c   : > { %v1012_v40 = vmul.f32 %v1011_v38, %v989_v39 }
 0x25e   : > { %v1025_v41 = vpack.c.bf16 %v1012_v40, %v1012_v40 }
 0x260   : > { %1452 = vmatmul.mubr.msk.bf16.vlgmr.msra.gmra.mrb[12].mxu1 %vm1032_vm11, %v1025_v41 }
 0x333   : > { %v1070_v48 = vpop.f32.mrb[12].mxu1 }
 0x334   : > { %1077 = vrot.lane.b32.xlu1 %v1070_v48, %s1611_s19  ;;  %v1453_v49 = vpop.f32.mrb[13].mxu1  ;;  %s1350_s19 = sshll.u32 %s1720_s25, 7  ;;  %s1613_s25 = smov [#allocation2]  }
 0x335   : > { %v1073_v50 = vpop.f32.mrb[14].mxu1  ;;  %s2028_s29 = scalar_lea.hbm %s2086_s16, %s1350_s19  ;;  %s1541_s23 = sshll.u32 %s1613_s25, 4  ;;  %s1542_s23 = int_to_ptr.vmem [resolvable:$false] %s1541_s23 }
 0x336   : > { %v1454_v51 = vpop.f32.mrb[15].mxu1  ;;  %s1543_s2 = scalar_lea.vmem %s1542_s23, 256  ;;  %p1544_p0 = scmp.lt.s32.totalorder %s2030_s26, %s1542_s23 }
 0x337   : > { %p1545_p1 = scmp.lt.s32.totalorder %s1543_s2, %s1537_s28 }
 0x339   : > { %p1546_p2 = por %p1545_p1, %p1544_p0 }
 0x33b   : > { %p1547_p3 = pnand %p1546_p2, %p1540_p13 }
 0x3a6   : > { %v1078_v54 = vpop.permute.xlu1 %1077 }
 0x3a7   : > { %v1080_v55 = vsel %vm981_vm0, %v1951_v5, %v1078_v54  ;;  %v1346_v5 = vld [vmem:[%s2085_s15] ss:$0 sm:$0xff] }
 0x3a8   : > { %v1084_v57 = vpack.c.bf16 %v1080_v55, %v1080_v55 }
 0x3aa   : > { %1460 = vmatmul.mubr.msk.bf16.vlgmr.msra.gmra.mrb[8].mxu0 %vm1094_vm12, %v1084_v57 }
 0x3ab   : > { %1464 = vmatpush3.bf16.msra.mxu0 %v1147_v56  ;;  %1467 = vmatprep.mubr.msk.bf16.mxu0 %vm1603_vm2, %v1601_v2 }
 0x3ac   : > { %1465 = vmatprep.subr.bf16.mxu0 %v1601_v2 }
 0x3af   : > { %1466 = vmatpush3.bf16.msra.mxu0 %v1148_v60 }
 0x47d   : > { %v1135_v62 = vpop.f32.mrb[8].mxu0 }
 0x47e   : > { %v1136_v63 = vadd.f32 %v1344_v61, %v1135_v62  ;;  %v1461_v0 = vpop.f32.mrb[9].mxu0 }
 0x47f   : > { %v1138_v1 = vpop.f32.mrb[10].mxu0 }
 0x480   : > { %v1141_v2 = vmax.f32 %v1136_v63, 0.0  ;;  %v1462_v3 = vpop.f32.mrb[11].mxu0 }
 0x482   : > { %v1146_v4 = vpack.c.bf16 %v1141_v2, %v1141_v2 }
 0x484   : > { %1468 = vmatmul.mubr.msk.bf16.vlgmr.msra.gmra.mrb[12].mxu0 %vm647_vm6, %v1146_v4 }
 0x557   : > { %v1193_v6 = vpop.f32.mrb[12].mxu0 }
 0x558   : > { %v1194_v7 = vadd.f32 %v1346_v5, %v1193_v6  ;;  %v1469_v8 = vpop.f32.mrb[13].mxu0 }
 0x559   : > { %v1196_v9 = vpop.f32.mrb[14].mxu0 }
 0x55a   : > { %v1348_v10 = vmul.f32 -1.442695, %v1194_v7  ;;  %v1470_v11 = vpop.f32.mrb[15].mxu0 }
 0x55c   : > { %1533 = vpow2.f32 %v1348_v10 }
 0x566   : > { %v1534_v12 = vpop.eup %1533 }
 0x567   : > { %v1202_v13 = vadd.f32 1.0, %v1534_v12 }
 0x569   : > { %1535 = vrcp.f32 %v1202_v13 }
 0x573   : > { %v1536_v14 = vpop.eup %1535 }
 0x574   : > { %1205 = vst [vmem:[%s551_s30] sm:$0xff] %v1536_v14 }
 0x575   : > { %1550 = shalt.err (!%p1547_p3)
}
 0x576   : > { %s1551_s1 = scalar_lea.hbm %s2028_s29, 128  ;;  %s1555_s20 = scalar_lea.hbm %s2086_s16, 256 }
 0x577   : > { %p1552_p4 = scmp.ne.s32.totalorder %s2028_s29, %s1551_s1  ;;  %p1556_p9 = scmp.lt.u32.totalorder %s2028_s29, %s2086_s16 }
 0x578   : > { %p1557_p10 = scmp.lt.u32.totalorder %s1555_s20, %s1551_s1  ;;  %p1559_p12 = scmp.lt.u32.totalorder %s1551_s1, %s2028_s29 }
 0x579   : > { %p1553_p7 = pnand %p1552_p4, %p1737_p5 }
 0x57a   : > { %p1558_p11 = por %p1557_p10, %p1556_p9 }
 0x57b   : > { %p1554_p8 = pneg %p1553_p7 }
 0x57c   : > { %p1560_p13 = por %p1559_p12, %p1558_p11 }
 0x57e   : > { %p1561_p0 = pnand %p1560_p13, %p1554_p8 }
 0x580   : > { %1564 = shalt.err (!%p1561_p0)
}
 0x581   : > { %1471 = dma.vmem_to_hbm [thread:$0]  (%p1737_p5), %s2030_s26, 128, %s2028_s29, %s1207_s18  }
 0x582 PF: > { %p1477_p1 = scmp.ge.s32.totalorder %s1599_s24, 2  ;;  %s1232_s2 = sand.u32 1, %s1587_s21  }
 0x583   : > { %s1233_s28 = scalar_lea.sflag [#allocation3], %s1232_s2 }
 0x584   : > { %p1474_p2 = pnand %p1477_p1, %p1741_p6 }
 0x586   : > { %1582 = dma.done.wait (!%p1474_p2), %s1233_s28, 128  }
 0x587   : > { %1584 = vsyncadd (!%p1474_p2), %s1233_s28, 4294967168  ;;  %s2105_s24 = sld [smem:[#allocation6_spill]]  ;;  %s2106_s23 = sld [smem:[#allocation5_spill]] }
 0x588   : > { %s2107_s1 = sld [smem:[#allocation7_spill]]  ;;  %s2108_s21 = smov %s1591_s22 }
 0x58d   : > { %p26_p3 = scmp.ge.s32.totalorder %s2105_s24, 4   ;;  %s2109_s22 = smov %s2106_s23 }
 0x58e   : > { %s2110_s23 = smov %s2107_s1 }
 0x58f   :  { %28 = sbr.rel (!%p26_p3) target bundleno = 7 (0x7), region = 128 }
 0x596   :  { %1238 = vsyncpa [#allocation3], 1 }
 0x597   :  { %1240 = vsyncpa [#allocation3 + $0x1], 1 }

</bundles_post_ra>
